<compile_context>
chip_gen: v5e
topology: v5e:2x2
jax: 0.10.0
libtpu: 0.0.40
codegen_flags: <defaults>
</compile_context>

<pallas_src>
import functools
import math

import jax
import jax.numpy as jnp
from jax.experimental import pallas as pl
from jax.experimental.pallas import tpu as pltpu

D_MODEL = 32
D_FF = 64
N_HEAD = 4
N_LAYERS = 2
SEQ = 8
BATCH = 2
EPS = 1e-5  # PyTorch nn.LayerNorm default


# ----------------------------------------------------------------------------
# Fused kernel: the whole encoder stack in one invocation.
# ----------------------------------------------------------------------------
def encoder_stack_kernel(x_ref, bias_ref,
                         wqkv_ref, bqkv_ref, wo_ref, bo_ref,
                         w1_ref, b1_ref, w2_ref, b2_ref,
                         g1_ref, be1_ref, g2_ref, be2_ref,
                         gf_ref, bf_ref,
                         out_ref, *, nlayers, nhead, batch, seq):
    d_model = x_ref.shape[-1]
    d_head = d_model // nhead
    scale = 1.0 / math.sqrt(d_head)

    x = x_ref[...]                                    # [B*S, D]
    # Additive key-padding bias, broadcast once for all layers / heads.
    bias = jnp.broadcast_to(bias_ref[...], (batch, seq, seq))   # [B, Sq, Sk]

    def layer_norm(h, g, b):
        mu = jnp.mean(h, axis=-1, keepdims=True)
        var = jnp.mean((h - mu) ** 2, axis=-1, keepdims=True)
        return (h - mu) * jax.lax.rsqrt(var + EPS) * g + b

    for l in range(nlayers):                          # static unroll over layers
        # --- fused QKV projection: one MXU push per layer ---
        qkv = jnp.dot(x, wqkv_ref[l],
                      preferred_element_type=jnp.float32) + bqkv_ref[l]   # [B*S, 3D]
        q = qkv[:, 0 * d_model:1 * d_model].reshape(batch, seq, d_model) * scale
        k = qkv[:, 1 * d_model:2 * d_model].reshape(batch, seq, d_model)
        v = qkv[:, 2 * d_model:3 * d_model].reshape(batch, seq, d_model)

        # --- multi-head attention: batch handled by the einsum batch dim,
        #     heads by a tiny static loop (nhead=4) over lane slices ---
        head_outs = []
        for h in range(nhead):
            sl = slice(h * d_head, (h + 1) * d_head)
            qh, kh, vh = q[..., sl], k[..., sl], v[..., sl]        # [B, S, dh]
            s = jnp.einsum('bqd,bkd->bqk', qh, kh,
                           preferred_element_type=jnp.float32)      # [B, S, S]
            s = s + bias                                            # mask padded keys
            s = s - jnp.max(s, axis=-1, keepdims=True)
            p = jnp.exp(s)
            p = p * pl.reciprocal(jnp.sum(p, axis=-1, keepdims=True), approx=True)
            head_outs.append(jnp.einsum('bqk,bkd->bqd', p, vh,
                                        preferred_element_type=jnp.float32))
        attn = jnp.concatenate(head_outs, axis=-1).reshape(batch * seq, d_model)
        attn = jnp.dot(attn, wo_ref[l],
                       preferred_element_type=jnp.float32) + bo_ref[l]

        # TODO(synk): dropout omitted — nn.Dropout is identity in eval/inference mode.

        # --- residual + LayerNorm 1 ---
        h1 = layer_norm(x + attn, g1_ref[l], be1_ref[l])

        # --- feed forward: Linear -> ReLU -> Linear ---
        ff = jnp.dot(h1, w1_ref[l], preferred_element_type=jnp.float32) + b1_ref[l]
        ff = jnp.maximum(ff, 0.0)
        ff = jnp.dot(ff, w2_ref[l], preferred_element_type=jnp.float32) + b2_ref[l]

        # --- residual + LayerNorm 2 ---
        x = layer_norm(h1 + ff, g2_ref[l], be2_ref[l])

    # --- final LayerNorm of the encoder stack ---
    out_ref[...] = layer_norm(x, gf_ref[...], bf_ref[...])


# ----------------------------------------------------------------------------
# Wrapper
# ----------------------------------------------------------------------------
def pack_params(params):
    """Stack per-layer weights on a leading layer axis; fuse WQ/WK/WV."""
    ls = params["layers"]
    wqkv = jnp.stack([jnp.concatenate([p[0], p[2], p[4]], axis=1) for p in ls])  # [L, D, 3D]
    bqkv = jnp.stack([jnp.concatenate([p[1], p[3], p[5]], axis=1) for p in ls])  # [L, 1, 3D]
    wo = jnp.stack([p[6] for p in ls]);   bo = jnp.stack([p[7] for p in ls])
    w1 = jnp.stack([p[8] for p in ls]);   b1 = jnp.stack([p[9] for p in ls])
    w2 = jnp.stack([p[10] for p in ls]);  b2 = jnp.stack([p[11] for p in ls])
    g1 = jnp.stack([p[12] for p in ls]);  be1 = jnp.stack([p[13] for p in ls])
    g2 = jnp.stack([p[14] for p in ls]);  be2 = jnp.stack([p[15] for p in ls])
    return (wqkv, bqkv, wo, bo, w1, b1, w2, b2, g1, be1, g2, be2)


def transformer_encoder(x, key_padding_mask, params):
    B, S, D = x.shape
    packed = pack_params(params)
    # Additive mask bias: -1e9 on padded keys, 0 elsewhere. Shape [B, 1, S].
    bias = jnp.where(key_padding_mask, jnp.float32(-1e9), jnp.float32(0.0)).reshape(B, 1, S)
    x2d = x.reshape(B * S, D)               # batch folded into the row dimension

    n_inputs = 2 + len(packed) + 2
    out2d = pl.pallas_call(
        functools.partial(encoder_stack_kernel,
                          nlayers=N_LAYERS, nhead=N_HEAD, batch=B, seq=S),
        out_shape=jax.ShapeDtypeStruct((B * S, D), jnp.float32),
        in_specs=[pl.BlockSpec(memory_space=pltpu.MemorySpace.VMEM)] * n_inputs,
        out_specs=pl.BlockSpec(memory_space=pltpu.MemorySpace.VMEM),
    )(x2d, bias, *packed, params["final_gamma"], params["final_beta"])
    return out2d.reshape(B, S, D)


# ----------------------------------------------------------------------------
# Deterministic parameter init + pure-JAX reference
# ----------------------------------------------------------------------------
def init_params(key):
    def linear(key, d_in, d_out):
        w = jax.random.normal(key, (d_in, d_out), jnp.float32) * 0.02
        b = jnp.zeros((1, d_out), jnp.float32)
        return w, b

    layers = []
    for _ in range(N_LAYERS):
        key, *ks = jax.random.split(key, 7)
        wq, bq = linear(ks[0], D_MODEL, D_MODEL)
        wk, bk = linear(ks[1], D_MODEL, D_MODEL)
        wv, bv = linear(ks[2], D_MODEL, D_MODEL)
        wo, bo = linear(ks[3], D_MODEL, D_MODEL)
        w1, b1 = linear(ks[4], D_MODEL, D_FF)
        w2, b2 = linear(ks[5], D_FF, D_MODEL)
        g1 = jnp.ones((1, D_MODEL), jnp.float32)
        be1 = jnp.zeros((1, D_MODEL), jnp.float32)
        g2 = jnp.ones((1, D_MODEL), jnp.float32)
        be2 = jnp.zeros((1, D_MODEL), jnp.float32)
        layers.append([wq, bq, wk, bk, wv, bv, wo, bo,
                       w1, b1, w2, b2, g1, be1, g2, be2])
    return {
        "layers": layers,
        "final_gamma": jnp.ones((1, D_MODEL), jnp.float32),
        "final_beta": jnp.zeros((1, D_MODEL), jnp.float32),
    }


def reference_forward(x, key_padding_mask, params):
    def ln(h, g, b):
        mu = h.mean(-1, keepdims=True)
        var = ((h - mu) ** 2).mean(-1, keepdims=True)
        return (h - mu) / jnp.sqrt(var + EPS) * g + b

    mask = key_padding_mask[:, None, None, :]  # [B,1,1,S]
    for (wq, bq, wk, bk, wv, bv, wo, bo,
         w1, b1, w2, b2, g1, be1, g2, be2) in params["layers"]:
        B, S, D = x.shape
        dh = D // N_HEAD
        q = (x @ wq + bq).reshape(B, S, N_HEAD, dh).transpose(0, 2, 1, 3)
        k = (x @ wk + bk).reshape(B, S, N_HEAD, dh).transpose(0, 2, 1, 3)
        v = (x @ wv + bv).reshape(B, S, N_HEAD, dh).transpose(0, 2, 1, 3)
        s = jnp.einsum("bhqd,bhkd->bhqk", q, k) / math.sqrt(dh)
        s = jnp.where(mask, -1e9, s)
        p = jax.nn.softmax(s, axis=-1)
        o = jnp.einsum("bhqk,bhkd->bhqd", p, v).transpose(0, 2, 1, 3).reshape(B, S, D)
        attn = o @ wo + bo
        h1 = ln(x + attn, g1, be1)
        ff = jnp.maximum(h1 @ w1 + b1, 0.0) @ w2 + b2
        x = ln(h1 + ff, g2, be2)
    return ln(x, params["final_gamma"], params["final_beta"])


# ----------------------------------------------------------------------------
if __name__ == "__main__":
    key = jax.random.PRNGKey(0)
    kx, kp = jax.random.split(key)
    x = jax.random.normal(kx, (BATCH, SEQ, D_MODEL), jnp.float32)
    key_padding_mask = jnp.zeros((BATCH, SEQ), jnp.bool_)
    key_padding_mask = key_padding_mask.at[1, -2:].set(True)  # pad last 2 tokens of batch 1

    params = init_params(kp)

    out = transformer_encoder(x, key_padding_mask, params)
    out = jax.block_until_ready(out)

    ref = reference_forward(x, key_padding_mask, params)
    assert out.shape == (BATCH, SEQ, D_MODEL)
    # Slightly relaxed tolerance: softmax denominator uses the EUP approximate
    # reciprocal (pl.reciprocal(approx=True)) per the performance review.
    err = jnp.max(jnp.abs(out - ref))
    assert jnp.allclose(out, ref, atol=1e-3, rtol=1e-3), f"max err {err}"
    print("KERNEL_OK")
</pallas_src>

<mosaic_0001>
module attributes {stable_mosaic.version = 11 : i64} {
  func.func @encoder_stack_kernel(%arg0: memref<16x32xf32, #tpu.memory_space<vmem>>, %arg1: memref<2x1x8xf32, #tpu.memory_space<vmem>>, %arg2: memref<2x32x96xf32, #tpu.memory_space<vmem>>, %arg3: memref<2x1x96xf32, #tpu.memory_space<vmem>>, %arg4: memref<2x32x32xf32, #tpu.memory_space<vmem>>, %arg5: memref<2x1x32xf32, #tpu.memory_space<vmem>>, %arg6: memref<2x32x64xf32, #tpu.memory_space<vmem>>, %arg7: memref<2x1x64xf32, #tpu.memory_space<vmem>>, %arg8: memref<2x64x32xf32, #tpu.memory_space<vmem>>, %arg9: memref<2x1x32xf32, #tpu.memory_space<vmem>>, %arg10: memref<2x1x32xf32, #tpu.memory_space<vmem>>, %arg11: memref<2x1x32xf32, #tpu.memory_space<vmem>>, %arg12: memref<2x1x32xf32, #tpu.memory_space<vmem>>, %arg13: memref<2x1x32xf32, #tpu.memory_space<vmem>>, %arg14: memref<1x32xf32, #tpu.memory_space<vmem>>, %arg15: memref<1x32xf32, #tpu.memory_space<vmem>>, %arg16: memref<16x32xf32, #tpu.memory_space<vmem>>) attributes {dimension_semantics = [], scalar_prefetch = 0 : i64, scratch_operands = 0 : i64, tpu.core_type = #tpu.core_type<tc>} {
    %c0 = arith.constant 0 : index
    %c0_0 = arith.constant 0 : index
    %0 = vector.load %arg0[%c0, %c0_0] : memref<16x32xf32, #tpu.memory_space<vmem>>, vector<16x32xf32>
    %c0_1 = arith.constant 0 : index
    %c0_2 = arith.constant 0 : index
    %c0_3 = arith.constant 0 : index
    %1 = vector.load %arg1[%c0_1, %c0_2, %c0_3] : memref<2x1x8xf32, #tpu.memory_space<vmem>>, vector<2x1x8xf32>
    %2 = vector.shape_cast %1 : vector<2x1x8xf32> to vector<2x1x8xf32>
    %3 = vector.broadcast %2 : vector<2x1x8xf32> to vector<2x8x8xf32>
    %c0_4 = arith.constant 0 : index
    %c0_5 = arith.constant 0 : index
    %c0_6 = arith.constant 0 : index
    %4 = vector.load %arg2[%c0_4, %c0_5, %c0_6] : memref<2x32x96xf32, #tpu.memory_space<vmem>>, vector<1x32x96xf32>
    %5 = vector.shape_cast %4 : vector<1x32x96xf32> to vector<32x96xf32>
    %cst = arith.constant dense<0.000000e+00> : vector<16x96xf32>
    %6 = tpu.matmul %0, %5, %cst {dimension_numbers = #tpu.dot_dimension_numbers<[1], [0], [0], [1], [0, 0, 1, 1], [], []>} : vector<16x32xf32>, vector<32x96xf32>, vector<16x96xf32> -> vector<16x96xf32>
    %c0_7 = arith.constant 0 : index
    %c0_8 = arith.constant 0 : index
    %c0_9 = arith.constant 0 : index
    %7 = vector.load %arg3[%c0_7, %c0_8, %c0_9] : memref<2x1x96xf32, #tpu.memory_space<vmem>>, vector<1x1x96xf32>
    %8 = vector.shape_cast %7 : vector<1x1x96xf32> to vector<1x96xf32>
    %9 = vector.broadcast %8 : vector<1x96xf32> to vector<16x96xf32>
    %10 = arith.addf %6, %9 : vector<16x96xf32>
    %11 = vector.extract_strided_slice %10 {offsets = [0, 0], sizes = [16, 32], strides = [1, 1]} : vector<16x96xf32> to vector<16x32xf32>
    %12 = vector.shape_cast %11 : vector<16x32xf32> to vector<2x8x32xf32>
    %cst_10 = arith.constant 0.353553385 : f32
    %13 = vector.broadcast %cst_10 : f32 to vector<2x8x32xf32>
    %14 = arith.mulf %12, %13 : vector<2x8x32xf32>
    %15 = vector.extract_strided_slice %10 {offsets = [0, 32], sizes = [16, 32], strides = [1, 1]} : vector<16x96xf32> to vector<16x32xf32>
    %16 = vector.shape_cast %15 : vector<16x32xf32> to vector<2x8x32xf32>
    %17 = vector.extract_strided_slice %10 {offsets = [0, 64], sizes = [16, 32], strides = [1, 1]} : vector<16x96xf32> to vector<16x32xf32>
    %18 = vector.shape_cast %17 : vector<16x32xf32> to vector<2x8x32xf32>
    %19 = vector.extract_strided_slice %14 {offsets = [0, 0, 0], sizes = [2, 8, 8], strides = [1, 1, 1]} : vector<2x8x32xf32> to vector<2x8x8xf32>
    %20 = vector.extract_strided_slice %16 {offsets = [0, 0, 0], sizes = [2, 8, 8], strides = [1, 1, 1]} : vector<2x8x32xf32> to vector<2x8x8xf32>
    %21 = vector.extract_strided_slice %18 {offsets = [0, 0, 0], sizes = [2, 8, 8], strides = [1, 1, 1]} : vector<2x8x32xf32> to vector<2x8x8xf32>
    "tpu.trace_start"() <{level = 10 : i32, message = "bqd,bkd->bqk"}> : () -> ()
    %cst_11 = arith.constant dense<0.000000e+00> : vector<2x8x8xf32>
    %22 = tpu.matmul %19, %20, %cst_11 {dimension_numbers = #tpu.dot_dimension_numbers<[2], [2], [1], [1], [0, 0, 0, 1, 1, 1], [0], [0]>} : vector<2x8x8xf32>, vector<2x8x8xf32>, vector<2x8x8xf32> -> vector<2x8x8xf32>
    "tpu.trace_stop"() : () -> ()
    %23 = arith.addf %22, %3 : vector<2x8x8xf32>
    %cst_12 = arith.constant dense<0xFF800000> : vector<2x8xf32>
    %24 = vector.multi_reduction <maximumf>, %23, %cst_12 [2] : vector<2x8x8xf32> to vector<2x8xf32>
    %25 = vector.shape_cast %24 : vector<2x8xf32> to vector<2x8x1xf32>
    %26 = vector.broadcast %25 : vector<2x8x1xf32> to vector<2x8x8xf32>
    %27 = arith.subf %23, %26 : vector<2x8x8xf32>
    %28 = math.exp %27 : vector<2x8x8xf32>
    %cst_13 = arith.constant dense<0.000000e+00> : vector<2x8xf32>
    %29 = vector.multi_reduction <add>, %28, %cst_13 [2] : vector<2x8x8xf32> to vector<2x8xf32>
    %30 = vector.shape_cast %29 : vector<2x8xf32> to vector<2x8x1xf32>
    %31 = tpu.reciprocal %30 {approx = true} : vector<2x8x1xf32> -> vector<2x8x1xf32>
    %32 = vector.broadcast %31 : vector<2x8x1xf32> to vector<2x8x8xf32>
    %33 = arith.mulf %28, %32 : vector<2x8x8xf32>
    "tpu.trace_start"() <{level = 10 : i32, message = "bqk,bkd->bqd"}> : () -> ()
    %cst_14 = arith.constant dense<0.000000e+00> : vector<2x8x8xf32>
    %34 = tpu.matmul %33, %21, %cst_14 {dimension_numbers = #tpu.dot_dimension_numbers<[2], [1], [1], [2], [0, 0, 0, 1, 1, 2], [0], [0]>} : vector<2x8x8xf32>, vector<2x8x8xf32>, vector<2x8x8xf32> -> vector<2x8x8xf32>
    "tpu.trace_stop"() : () -> ()
    %35 = vector.extract_strided_slice %14 {offsets = [0, 0, 8], sizes = [2, 8, 8], strides = [1, 1, 1]} : vector<2x8x32xf32> to vector<2x8x8xf32>
    %36 = vector.extract_strided_slice %16 {offsets = [0, 0, 8], sizes = [2, 8, 8], strides = [1, 1, 1]} : vector<2x8x32xf32> to vector<2x8x8xf32>
    %37 = vector.extract_strided_slice %18 {offsets = [0, 0, 8], sizes = [2, 8, 8], strides = [1, 1, 1]} : vector<2x8x32xf32> to vector<2x8x8xf32>
    "tpu.trace_start"() <{level = 10 : i32, message = "bqd,bkd->bqk"}> : () -> ()
    %cst_15 = arith.constant dense<0.000000e+00> : vector<2x8x8xf32>
    %38 = tpu.matmul %35, %36, %cst_15 {dimension_numbers = #tpu.dot_dimension_numbers<[2], [2], [1], [1], [0, 0, 0, 1, 1, 1], [0], [0]>} : vector<2x8x8xf32>, vector<2x8x8xf32>, vector<2x8x8xf32> -> vector<2x8x8xf32>
    "tpu.trace_stop"() : () -> ()
    %39 = arith.addf %38, %3 : vector<2x8x8xf32>
    %cst_16 = arith.constant dense<0xFF800000> : vector<2x8xf32>
    %40 = vector.multi_reduction <maximumf>, %39, %cst_16 [2] : vector<2x8x8xf32> to vector<2x8xf32>
    %41 = vector.shape_cast %40 : vector<2x8xf32> to vector<2x8x1xf32>
    %42 = vector.broadcast %41 : vector<2x8x1xf32> to vector<2x8x8xf32>
    %43 = arith.subf %39, %42 : vector<2x8x8xf32>
    %44 = math.exp %43 : vector<2x8x8xf32>
    %cst_17 = arith.constant dense<0.000000e+00> : vector<2x8xf32>
    %45 = vector.multi_reduction <add>, %44, %cst_17 [2] : vector<2x8x8xf32> to vector<2x8xf32>
    %46 = vector.shape_cast %45 : vector<2x8xf32> to vector<2x8x1xf32>
    %47 = tpu.reciprocal %46 {approx = true} : vector<2x8x1xf32> -> vector<2x8x1xf32>
    %48 = vector.broadcast %47 : vector<2x8x1xf32> to vector<2x8x8xf32>
    %49 = arith.mulf %44, %48 : vector<2x8x8xf32>
    "tpu.trace_start"() <{level = 10 : i32, message = "bqk,bkd->bqd"}> : () -> ()
    %cst_18 = arith.constant dense<0.000000e+00> : vector<2x8x8xf32>
    %50 = tpu.matmul %49, %37, %cst_18 {dimension_numbers = #tpu.dot_dimension_numbers<[2], [1], [1], [2], [0, 0, 0, 1, 1, 2], [0], [0]>} : vector<2x8x8xf32>, vector<2x8x8xf32>, vector<2x8x8xf32> -> vector<2x8x8xf32>
    "tpu.trace_stop"() : () -> ()
    %51 = vector.extract_strided_slice %14 {offsets = [0, 0, 16], sizes = [2, 8, 8], strides = [1, 1, 1]} : vector<2x8x32xf32> to vector<2x8x8xf32>
    %52 = vector.extract_strided_slice %16 {offsets = [0, 0, 16], sizes = [2, 8, 8], strides = [1, 1, 1]} : vector<2x8x32xf32> to vector<2x8x8xf32>
    %53 = vector.extract_strided_slice %18 {offsets = [0, 0, 16], sizes = [2, 8, 8], strides = [1, 1, 1]} : vector<2x8x32xf32> to vector<2x8x8xf32>
    "tpu.trace_start"() <{level = 10 : i32, message = "bqd,bkd->bqk"}> : () -> ()
    %cst_19 = arith.constant dense<0.000000e+00> : vector<2x8x8xf32>
    %54 = tpu.matmul %51, %52, %cst_19 {dimension_numbers = #tpu.dot_dimension_numbers<[2], [2], [1], [1], [0, 0, 0, 1, 1, 1], [0], [0]>} : vector<2x8x8xf32>, vector<2x8x8xf32>, vector<2x8x8xf32> -> vector<2x8x8xf32>
    "tpu.trace_stop"() : () -> ()
    %55 = arith.addf %54, %3 : vector<2x8x8xf32>
    %cst_20 = arith.constant dense<0xFF800000> : vector<2x8xf32>
    %56 = vector.multi_reduction <maximumf>, %55, %cst_20 [2] : vector<2x8x8xf32> to vector<2x8xf32>
    %57 = vector.shape_cast %56 : vector<2x8xf32> to vector<2x8x1xf32>
    %58 = vector.broadcast %57 : vector<2x8x1xf32> to vector<2x8x8xf32>
    %59 = arith.subf %55, %58 : vector<2x8x8xf32>
    %60 = math.exp %59 : vector<2x8x8xf32>
    %cst_21 = arith.constant dense<0.000000e+00> : vector<2x8xf32>
    %61 = vector.multi_reduction <add>, %60, %cst_21 [2] : vector<2x8x8xf32> to vector<2x8xf32>
    %62 = vector.shape_cast %61 : vector<2x8xf32> to vector<2x8x1xf32>
    %63 = tpu.reciprocal %62 {approx = true} : vector<2x8x1xf32> -> vector<2x8x1xf32>
    %64 = vector.broadcast %63 : vector<2x8x1xf32> to vector<2x8x8xf32>
    %65 = arith.mulf %60, %64 : vector<2x8x8xf32>
    "tpu.trace_start"() <{level = 10 : i32, message = "bqk,bkd->bqd"}> : () -> ()
    %cst_22 = arith.constant dense<0.000000e+00> : vector<2x8x8xf32>
    %66 = tpu.matmul %65, %53, %cst_22 {dimension_numbers = #tpu.dot_dimension_numbers<[2], [1], [1], [2], [0, 0, 0, 1, 1, 2], [0], [0]>} : vector<2x8x8xf32>, vector<2x8x8xf32>, vector<2x8x8xf32> -> vector<2x8x8xf32>
    "tpu.trace_stop"() : () -> ()
    %67 = vector.extract_strided_slice %14 {offsets = [0, 0, 24], sizes = [2, 8, 8], strides = [1, 1, 1]} : vector<2x8x32xf32> to vector<2x8x8xf32>
    %68 = vector.extract_strided_slice %16 {offsets = [0, 0, 24], sizes = [2, 8, 8], strides = [1, 1, 1]} : vector<2x8x32xf32> to vector<2x8x8xf32>
    %69 = vector.extract_strided_slice %18 {offsets = [0, 0, 24], sizes = [2, 8, 8], strides = [1, 1, 1]} : vector<2x8x32xf32> to vector<2x8x8xf32>
    "tpu.trace_start"() <{level = 10 : i32, message = "bqd,bkd->bqk"}> : () -> ()
    %cst_23 = arith.constant dense<0.000000e+00> : vector<2x8x8xf32>
    %70 = tpu.matmul %67, %68, %cst_23 {dimension_numbers = #tpu.dot_dimension_numbers<[2], [2], [1], [1], [0, 0, 0, 1, 1, 1], [0], [0]>} : vector<2x8x8xf32>, vector<2x8x8xf32>, vector<2x8x8xf32> -> vector<2x8x8xf32>
    "tpu.trace_stop"() : () -> ()
    %71 = arith.addf %70, %3 : vector<2x8x8xf32>
    %cst_24 = arith.constant dense<0xFF800000> : vector<2x8xf32>
    %72 = vector.multi_reduction <maximumf>, %71, %cst_24 [2] : vector<2x8x8xf32> to vector<2x8xf32>
    %73 = vector.shape_cast %72 : vector<2x8xf32> to vector<2x8x1xf32>
    %74 = vector.broadcast %73 : vector<2x8x1xf32> to vector<2x8x8xf32>
    %75 = arith.subf %71, %74 : vector<2x8x8xf32>
    %76 = math.exp %75 : vector<2x8x8xf32>
    %cst_25 = arith.constant dense<0.000000e+00> : vector<2x8xf32>
    %77 = vector.multi_reduction <add>, %76, %cst_25 [2] : vector<2x8x8xf32> to vector<2x8xf32>
    %78 = vector.shape_cast %77 : vector<2x8xf32> to vector<2x8x1xf32>
    %79 = tpu.reciprocal %78 {approx = true} : vector<2x8x1xf32> -> vector<2x8x1xf32>
    %80 = vector.broadcast %79 : vector<2x8x1xf32> to vector<2x8x8xf32>
    %81 = arith.mulf %76, %80 : vector<2x8x8xf32>
    "tpu.trace_start"() <{level = 10 : i32, message = "bqk,bkd->bqd"}> : () -> ()
    %cst_26 = arith.constant dense<0.000000e+00> : vector<2x8x8xf32>
    %82 = tpu.matmul %81, %69, %cst_26 {dimension_numbers = #tpu.dot_dimension_numbers<[2], [1], [1], [2], [0, 0, 0, 1, 1, 2], [0], [0]>} : vector<2x8x8xf32>, vector<2x8x8xf32>, vector<2x8x8xf32> -> vector<2x8x8xf32>
    "tpu.trace_stop"() : () -> ()
    %83 = tpu.concatenate %34, %50, %66, %82 in 2 : vector<2x8x8xf32>, vector<2x8x8xf32>, vector<2x8x8xf32>, vector<2x8x8xf32> -> vector<2x8x32xf32>
    %84 = vector.shape_cast %83 : vector<2x8x32xf32> to vector<16x32xf32>
    %c0_27 = arith.constant 0 : index
    %c0_28 = arith.constant 0 : index
    %c0_29 = arith.constant 0 : index
    %85 = vector.load %arg4[%c0_27, %c0_28, %c0_29] : memref<2x32x32xf32, #tpu.memory_space<vmem>>, vector<1x32x32xf32>
    %86 = vector.shape_cast %85 : vector<1x32x32xf32> to vector<32x32xf32>
    %cst_30 = arith.constant dense<0.000000e+00> : vector<16x32xf32>
    %87 = tpu.matmul %84, %86, %cst_30 {dimension_numbers = #tpu.dot_dimension_numbers<[1], [0], [0], [1], [0, 0, 1, 1], [], []>} : vector<16x32xf32>, vector<32x32xf32>, vector<16x32xf32> -> vector<16x32xf32>
    %c0_31 = arith.constant 0 : index
    %c0_32 = arith.constant 0 : index
    %c0_33 = arith.constant 0 : index
    %88 = vector.load %arg5[%c0_31, %c0_32, %c0_33] : memref<2x1x32xf32, #tpu.memory_space<vmem>>, vector<1x1x32xf32>
    %89 = vector.shape_cast %88 : vector<1x1x32xf32> to vector<1x32xf32>
    %90 = vector.broadcast %89 : vector<1x32xf32> to vector<16x32xf32>
    %91 = arith.addf %87, %90 : vector<16x32xf32>
    %92 = arith.addf %0, %91 : vector<16x32xf32>
    %c0_34 = arith.constant 0 : index
    %c0_35 = arith.constant 0 : index
    %c0_36 = arith.constant 0 : index
    %93 = vector.load %arg10[%c0_34, %c0_35, %c0_36] : memref<2x1x32xf32, #tpu.memory_space<vmem>>, vector<1x1x32xf32>
    %94 = vector.shape_cast %93 : vector<1x1x32xf32> to vector<1x32xf32>
    %c0_37 = arith.constant 0 : index
    %c0_38 = arith.constant 0 : index
    %c0_39 = arith.constant 0 : index
    %95 = vector.load %arg11[%c0_37, %c0_38, %c0_39] : memref<2x1x32xf32, #tpu.memory_space<vmem>>, vector<1x1x32xf32>
    %96 = vector.shape_cast %95 : vector<1x1x32xf32> to vector<1x32xf32>
    %cst_40 = arith.constant dense<0.000000e+00> : vector<16xf32>
    %97 = vector.multi_reduction <add>, %92, %cst_40 [1] : vector<16x32xf32> to vector<16xf32>
    %98 = vector.shape_cast %97 : vector<16xf32> to vector<16x1xf32>
    %cst_41 = arith.constant 3.200000e+01 : f32
    %99 = vector.broadcast %cst_41 : f32 to vector<16x1xf32>
    %100 = arith.divf %98, %99 : vector<16x1xf32>
    %101 = vector.broadcast %100 : vector<16x1xf32> to vector<16x32xf32>
    %102 = arith.subf %92, %101 : vector<16x32xf32>
    %103 = arith.mulf %102, %102 : vector<16x32xf32>
    %cst_42 = arith.constant dense<0.000000e+00> : vector<16xf32>
    %104 = vector.multi_reduction <add>, %103, %cst_42 [1] : vector<16x32xf32> to vector<16xf32>
    %105 = vector.shape_cast %104 : vector<16xf32> to vector<16x1xf32>
    %cst_43 = arith.constant 3.200000e+01 : f32
    %106 = vector.broadcast %cst_43 : f32 to vector<16x1xf32>
    %107 = arith.divf %105, %106 : vector<16x1xf32>
    %108 = vector.broadcast %100 : vector<16x1xf32> to vector<16x32xf32>
    %109 = arith.subf %92, %108 : vector<16x32xf32>
    %cst_44 = arith.constant 9.99999974E-6 : f32
    %110 = vector.broadcast %cst_44 : f32 to vector<16x1xf32>
    %111 = arith.addf %107, %110 : vector<16x1xf32>
    %112 = math.rsqrt %111 : vector<16x1xf32>
    %113 = vector.broadcast %112 : vector<16x1xf32> to vector<16x32xf32>
    %114 = arith.mulf %109, %113 : vector<16x32xf32>
    %115 = vector.broadcast %94 : vector<1x32xf32> to vector<16x32xf32>
    %116 = arith.mulf %114, %115 : vector<16x32xf32>
    %117 = vector.broadcast %96 : vector<1x32xf32> to vector<16x32xf32>
    %118 = arith.addf %116, %117 : vector<16x32xf32>
    %c0_45 = arith.constant 0 : index
    %c0_46 = arith.constant 0 : index
    %c0_47 = arith.constant 0 : index
    %119 = vector.load %arg6[%c0_45, %c0_46, %c0_47] : memref<2x32x64xf32, #tpu.memory_space<vmem>>, vector<1x32x64xf32>
    %120 = vector.shape_cast %119 : vector<1x32x64xf32> to vector<32x64xf32>
    %cst_48 = arith.constant dense<0.000000e+00> : vector<16x64xf32>
    %121 = tpu.matmul %118, %120, %cst_48 {dimension_numbers = #tpu.dot_dimension_numbers<[1], [0], [0], [1], [0, 0, 1, 1], [], []>} : vector<16x32xf32>, vector<32x64xf32>, vector<16x64xf32> -> vector<16x64xf32>
    %c0_49 = arith.constant 0 : index
    %c0_50 = arith.constant 0 : index
    %c0_51 = arith.constant 0 : index
    %122 = vector.load %arg7[%c0_49, %c0_50, %c0_51] : memref<2x1x64xf32, #tpu.memory_space<vmem>>, vector<1x1x64xf32>
    %123 = vector.shape_cast %122 : vector<1x1x64xf32> to vector<1x64xf32>
    %124 = vector.broadcast %123 : vector<1x64xf32> to vector<16x64xf32>
    %125 = arith.addf %121, %124 : vector<16x64xf32>
    %cst_52 = arith.constant 0.000000e+00 : f32
    %126 = vector.broadcast %cst_52 : f32 to vector<16x64xf32>
    %127 = arith.maximumf %125, %126 : vector<16x64xf32>
    %c0_53 = arith.constant 0 : index
    %c0_54 = arith.constant 0 : index
    %c0_55 = arith.constant 0 : index
    %128 = vector.load %arg8[%c0_53, %c0_54, %c0_55] : memref<2x64x32xf32, #tpu.memory_space<vmem>>, vector<1x64x32xf32>
    %129 = vector.shape_cast %128 : vector<1x64x32xf32> to vector<64x32xf32>
    %cst_56 = arith.constant dense<0.000000e+00> : vector<16x32xf32>
    %130 = tpu.matmul %127, %129, %cst_56 {dimension_numbers = #tpu.dot_dimension_numbers<[1], [0], [0], [1], [0, 0, 1, 1], [], []>} : vector<16x64xf32>, vector<64x32xf32>, vector<16x32xf32> -> vector<16x32xf32>
    %c0_57 = arith.constant 0 : index
    %c0_58 = arith.constant 0 : index
    %c0_59 = arith.constant 0 : index
    %131 = vector.load %arg9[%c0_57, %c0_58, %c0_59] : memref<2x1x32xf32, #tpu.memory_space<vmem>>, vector<1x1x32xf32>
    %132 = vector.shape_cast %131 : vector<1x1x32xf32> to vector<1x32xf32>
    %133 = vector.broadcast %132 : vector<1x32xf32> to vector<16x32xf32>
    %134 = arith.addf %130, %133 : vector<16x32xf32>
    %135 = arith.addf %118, %134 : vector<16x32xf32>
    %c0_60 = arith.constant 0 : index
    %c0_61 = arith.constant 0 : index
    %c0_62 = arith.constant 0 : index
    %136 = vector.load %arg12[%c0_60, %c0_61, %c0_62] : memref<2x1x32xf32, #tpu.memory_space<vmem>>, vector<1x1x32xf32>
    %137 = vector.shape_cast %136 : vector<1x1x32xf32> to vector<1x32xf32>
    %c0_63 = arith.constant 0 : index
    %c0_64 = arith.constant 0 : index
    %c0_65 = arith.constant 0 : index
    %138 = vector.load %arg13[%c0_63, %c0_64, %c0_65] : memref<2x1x32xf32, #tpu.memory_space<vmem>>, vector<1x1x32xf32>
    %139 = vector.shape_cast %138 : vector<1x1x32xf32> to vector<1x32xf32>
    %cst_66 = arith.constant dense<0.000000e+00> : vector<16xf32>
    %140 = vector.multi_reduction <add>, %135, %cst_66 [1] : vector<16x32xf32> to vector<16xf32>
    %141 = vector.shape_cast %140 : vector<16xf32> to vector<16x1xf32>
    %cst_67 = arith.constant 3.200000e+01 : f32
    %142 = vector.broadcast %cst_67 : f32 to vector<16x1xf32>
    %143 = arith.divf %141, %142 : vector<16x1xf32>
    %144 = vector.broadcast %143 : vector<16x1xf32> to vector<16x32xf32>
    %145 = arith.subf %135, %144 : vector<16x32xf32>
    %146 = arith.mulf %145, %145 : vector<16x32xf32>
    %cst_68 = arith.constant dense<0.000000e+00> : vector<16xf32>
    %147 = vector.multi_reduction <add>, %146, %cst_68 [1] : vector<16x32xf32> to vector<16xf32>
    %148 = vector.shape_cast %147 : vector<16xf32> to vector<16x1xf32>
    %cst_69 = arith.constant 3.200000e+01 : f32
    %149 = vector.broadcast %cst_69 : f32 to vector<16x1xf32>
    %150 = arith.divf %148, %149 : vector<16x1xf32>
    %151 = vector.broadcast %143 : vector<16x1xf32> to vector<16x32xf32>
    %152 = arith.subf %135, %151 : vector<16x32xf32>
    %cst_70 = arith.constant 9.99999974E-6 : f32
    %153 = vector.broadcast %cst_70 : f32 to vector<16x1xf32>
    %154 = arith.addf %150, %153 : vector<16x1xf32>
    %155 = math.rsqrt %154 : vector<16x1xf32>
    %156 = vector.broadcast %155 : vector<16x1xf32> to vector<16x32xf32>
    %157 = arith.mulf %152, %156 : vector<16x32xf32>
    %158 = vector.broadcast %137 : vector<1x32xf32> to vector<16x32xf32>
    %159 = arith.mulf %157, %158 : vector<16x32xf32>
    %160 = vector.broadcast %139 : vector<1x32xf32> to vector<16x32xf32>
    %161 = arith.addf %159, %160 : vector<16x32xf32>
    %c1 = arith.constant 1 : index
    %c0_71 = arith.constant 0 : index
    %c0_72 = arith.constant 0 : index
    %162 = vector.load %arg2[%c1, %c0_71, %c0_72] : memref<2x32x96xf32, #tpu.memory_space<vmem>>, vector<1x32x96xf32>
    %163 = vector.shape_cast %162 : vector<1x32x96xf32> to vector<32x96xf32>
    %cst_73 = arith.constant dense<0.000000e+00> : vector<16x96xf32>
    %164 = tpu.matmul %161, %163, %cst_73 {dimension_numbers = #tpu.dot_dimension_numbers<[1], [0], [0], [1], [0, 0, 1, 1], [], []>} : vector<16x32xf32>, vector<32x96xf32>, vector<16x96xf32> -> vector<16x96xf32>
    %c1_74 = arith.constant 1 : index
    %c0_75 = arith.constant 0 : index
    %c0_76 = arith.constant 0 : index
    %165 = vector.load %arg3[%c1_74, %c0_75, %c0_76] : memref<2x1x96xf32, #tpu.memory_space<vmem>>, vector<1x1x96xf32>
    %166 = vector.shape_cast %165 : vector<1x1x96xf32> to vector<1x96xf32>
    %167 = vector.broadcast %166 : vector<1x96xf32> to vector<16x96xf32>
    %168 = arith.addf %164, %167 : vector<16x96xf32>
    %169 = vector.extract_strided_slice %168 {offsets = [0, 0], sizes = [16, 32], strides = [1, 1]} : vector<16x96xf32> to vector<16x32xf32>
    %170 = vector.shape_cast %169 : vector<16x32xf32> to vector<2x8x32xf32>
    %cst_77 = arith.constant 0.353553385 : f32
    %171 = vector.broadcast %cst_77 : f32 to vector<2x8x32xf32>
    %172 = arith.mulf %170, %171 : vector<2x8x32xf32>
    %173 = vector.extract_strided_slice %168 {offsets = [0, 32], sizes = [16, 32], strides = [1, 1]} : vector<16x96xf32> to vector<16x32xf32>
    %174 = vector.shape_cast %173 : vector<16x32xf32> to vector<2x8x32xf32>
    %175 = vector.extract_strided_slice %168 {offsets = [0, 64], sizes = [16, 32], strides = [1, 1]} : vector<16x96xf32> to vector<16x32xf32>
    %176 = vector.shape_cast %175 : vector<16x32xf32> to vector<2x8x32xf32>
    %177 = vector.extract_strided_slice %172 {offsets = [0, 0, 0], sizes = [2, 8, 8], strides = [1, 1, 1]} : vector<2x8x32xf32> to vector<2x8x8xf32>
    %178 = vector.extract_strided_slice %174 {offsets = [0, 0, 0], sizes = [2, 8, 8], strides = [1, 1, 1]} : vector<2x8x32xf32> to vector<2x8x8xf32>
    %179 = vector.extract_strided_slice %176 {offsets = [0, 0, 0], sizes = [2, 8, 8], strides = [1, 1, 1]} : vector<2x8x32xf32> to vector<2x8x8xf32>
    "tpu.trace_start"() <{level = 10 : i32, message = "bqd,bkd->bqk"}> : () -> ()
    %cst_78 = arith.constant dense<0.000000e+00> : vector<2x8x8xf32>
    %180 = tpu.matmul %177, %178, %cst_78 {dimension_numbers = #tpu.dot_dimension_numbers<[2], [2], [1], [1], [0, 0, 0, 1, 1, 1], [0], [0]>} : vector<2x8x8xf32>, vector<2x8x8xf32>, vector<2x8x8xf32> -> vector<2x8x8xf32>
    "tpu.trace_stop"() : () -> ()
    %181 = arith.addf %180, %3 : vector<2x8x8xf32>
    %cst_79 = arith.constant dense<0xFF800000> : vector<2x8xf32>
    %182 = vector.multi_reduction <maximumf>, %181, %cst_79 [2] : vector<2x8x8xf32> to vector<2x8xf32>
    %183 = vector.shape_cast %182 : vector<2x8xf32> to vector<2x8x1xf32>
    %184 = vector.broadcast %183 : vector<2x8x1xf32> to vector<2x8x8xf32>
    %185 = arith.subf %181, %184 : vector<2x8x8xf32>
    %186 = math.exp %185 : vector<2x8x8xf32>
    %cst_80 = arith.constant dense<0.000000e+00> : vector<2x8xf32>
    %187 = vector.multi_reduction <add>, %186, %cst_80 [2] : vector<2x8x8xf32> to vector<2x8xf32>
    %188 = vector.shape_cast %187 : vector<2x8xf32> to vector<2x8x1xf32>
    %189 = tpu.reciprocal %188 {approx = true} : vector<2x8x1xf32> -> vector<2x8x1xf32>
    %190 = vector.broadcast %189 : vector<2x8x1xf32> to vector<2x8x8xf32>
    %191 = arith.mulf %186, %190 : vector<2x8x8xf32>
    "tpu.trace_start"() <{level = 10 : i32, message = "bqk,bkd->bqd"}> : () -> ()
    %cst_81 = arith.constant dense<0.000000e+00> : vector<2x8x8xf32>
    %192 = tpu.matmul %191, %179, %cst_81 {dimension_numbers = #tpu.dot_dimension_numbers<[2], [1], [1], [2], [0, 0, 0, 1, 1, 2], [0], [0]>} : vector<2x8x8xf32>, vector<2x8x8xf32>, vector<2x8x8xf32> -> vector<2x8x8xf32>
    "tpu.trace_stop"() : () -> ()
    %193 = vector.extract_strided_slice %172 {offsets = [0, 0, 8], sizes = [2, 8, 8], strides = [1, 1, 1]} : vector<2x8x32xf32> to vector<2x8x8xf32>
    %194 = vector.extract_strided_slice %174 {offsets = [0, 0, 8], sizes = [2, 8, 8], strides = [1, 1, 1]} : vector<2x8x32xf32> to vector<2x8x8xf32>
    %195 = vector.extract_strided_slice %176 {offsets = [0, 0, 8], sizes = [2, 8, 8], strides = [1, 1, 1]} : vector<2x8x32xf32> to vector<2x8x8xf32>
    "tpu.trace_start"() <{level = 10 : i32, message = "bqd,bkd->bqk"}> : () -> ()
    %cst_82 = arith.constant dense<0.000000e+00> : vector<2x8x8xf32>
    %196 = tpu.matmul %193, %194, %cst_82 {dimension_numbers = #tpu.dot_dimension_numbers<[2], [2], [1], [1], [0, 0, 0, 1, 1, 1], [0], [0]>} : vector<2x8x8xf32>, vector<2x8x8xf32>, vector<2x8x8xf32> -> vector<2x8x8xf32>
    "tpu.trace_stop"() : () -> ()
    %197 = arith.addf %196, %3 : vector<2x8x8xf32>
    %cst_83 = arith.constant dense<0xFF800000> : vector<2x8xf32>
    %198 = vector.multi_reduction <maximumf>, %197, %cst_83 [2] : vector<2x8x8xf32> to vector<2x8xf32>
    %199 = vector.shape_cast %198 : vector<2x8xf32> to vector<2x8x1xf32>
    %200 = vector.broadcast %199 : vector<2x8x1xf32> to vector<2x8x8xf32>
    %201 = arith.subf %197, %200 : vector<2x8x8xf32>
    %202 = math.exp %201 : vector<2x8x8xf32>
    %cst_84 = arith.constant dense<0.000000e+00> : vector<2x8xf32>
    %203 = vector.multi_reduction <add>, %202, %cst_84 [2] : vector<2x8x8xf32> to vector<2x8xf32>
    %204 = vector.shape_cast %203 : vector<2x8xf32> to vector<2x8x1xf32>
    %205 = tpu.reciprocal %204 {approx = true} : vector<2x8x1xf32> -> vector<2x8x1xf32>
    %206 = vector.broadcast %205 : vector<2x8x1xf32> to vector<2x8x8xf32>
    %207 = arith.mulf %202, %206 : vector<2x8x8xf32>
    "tpu.trace_start"() <{level = 10 : i32, message = "bqk,bkd->bqd"}> : () -> ()
    %cst_85 = arith.constant dense<0.000000e+00> : vector<2x8x8xf32>
    %208 = tpu.matmul %207, %195, %cst_85 {dimension_numbers = #tpu.dot_dimension_numbers<[2], [1], [1], [2], [0, 0, 0, 1, 1, 2], [0], [0]>} : vector<2x8x8xf32>, vector<2x8x8xf32>, vector<2x8x8xf32> -> vector<2x8x8xf32>
    "tpu.trace_stop"() : () -> ()
    %209 = vector.extract_strided_slice %172 {offsets = [0, 0, 16], sizes = [2, 8, 8], strides = [1, 1, 1]} : vector<2x8x32xf32> to vector<2x8x8xf32>
    %210 = vector.extract_strided_slice %174 {offsets = [0, 0, 16], sizes = [2, 8, 8], strides = [1, 1, 1]} : vector<2x8x32xf32> to vector<2x8x8xf32>
    %211 = vector.extract_strided_slice %176 {offsets = [0, 0, 16], sizes = [2, 8, 8], strides = [1, 1, 1]} : vector<2x8x32xf32> to vector<2x8x8xf32>
    "tpu.trace_start"() <{level = 10 : i32, message = "bqd,bkd->bqk"}> : () -> ()
    %cst_86 = arith.constant dense<0.000000e+00> : vector<2x8x8xf32>
    %212 = tpu.matmul %209, %210, %cst_86 {dimension_numbers = #tpu.dot_dimension_numbers<[2], [2], [1], [1], [0, 0, 0, 1, 1, 1], [0], [0]>} : vector<2x8x8xf32>, vector<2x8x8xf32>, vector<2x8x8xf32> -> vector<2x8x8xf32>
    "tpu.trace_stop"() : () -> ()
    %213 = arith.addf %212, %3 : vector<2x8x8xf32>
    %cst_87 = arith.constant dense<0xFF800000> : vector<2x8xf32>
    %214 = vector.multi_reduction <maximumf>, %213, %cst_87 [2] : vector<2x8x8xf32> to vector<2x8xf32>
    %215 = vector.shape_cast %214 : vector<2x8xf32> to vector<2x8x1xf32>
    %216 = vector.broadcast %215 : vector<2x8x1xf32> to vector<2x8x8xf32>
    %217 = arith.subf %213, %216 : vector<2x8x8xf32>
    %218 = math.exp %217 : vector<2x8x8xf32>
    %cst_88 = arith.constant dense<0.000000e+00> : vector<2x8xf32>
    %219 = vector.multi_reduction <add>, %218, %cst_88 [2] : vector<2x8x8xf32> to vector<2x8xf32>
    %220 = vector.shape_cast %219 : vector<2x8xf32> to vector<2x8x1xf32>
    %221 = tpu.reciprocal %220 {approx = true} : vector<2x8x1xf32> -> vector<2x8x1xf32>
    %222 = vector.broadcast %221 : vector<2x8x1xf32> to vector<2x8x8xf32>
    %223 = arith.mulf %218, %222 : vector<2x8x8xf32>
    "tpu.trace_start"() <{level = 10 : i32, message = "bqk,bkd->bqd"}> : () -> ()
    %cst_89 = arith.constant dense<0.000000e+00> : vector<2x8x8xf32>
    %224 = tpu.matmul %223, %211, %cst_89 {dimension_numbers = #tpu.dot_dimension_numbers<[2], [1], [1], [2], [0, 0, 0, 1, 1, 2], [0], [0]>} : vector<2x8x8xf32>, vector<2x8x8xf32>, vector<2x8x8xf32> -> vector<2x8x8xf32>
    "tpu.trace_stop"() : () -> ()
    %225 = vector.extract_strided_slice %172 {offsets = [0, 0, 24], sizes = [2, 8, 8], strides = [1, 1, 1]} : vector<2x8x32xf32> to vector<2x8x8xf32>
    %226 = vector.extract_strided_slice %174 {offsets = [0, 0, 24], sizes = [2, 8, 8], strides = [1, 1, 1]} : vector<2x8x32xf32> to vector<2x8x8xf32>
    %227 = vector.extract_strided_slice %176 {offsets = [0, 0, 24], sizes = [2, 8, 8], strides = [1, 1, 1]} : vector<2x8x32xf32> to vector<2x8x8xf32>
    "tpu.trace_start"() <{level = 10 : i32, message = "bqd,bkd->bqk"}> : () -> ()
    %cst_90 = arith.constant dense<0.000000e+00> : vector<2x8x8xf32>
    %228 = tpu.matmul %225, %226, %cst_90 {dimension_numbers = #tpu.dot_dimension_numbers<[2], [2], [1], [1], [0, 0, 0, 1, 1, 1], [0], [0]>} : vector<2x8x8xf32>, vector<2x8x8xf32>, vector<2x8x8xf32> -> vector<2x8x8xf32>
    "tpu.trace_stop"() : () -> ()
    %229 = arith.addf %228, %3 : vector<2x8x8xf32>
    %cst_91 = arith.constant dense<0xFF800000> : vector<2x8xf32>
    %230 = vector.multi_reduction <maximumf>, %229, %cst_91 [2] : vector<2x8x8xf32> to vector<2x8xf32>
    %231 = vector.shape_cast %230 : vector<2x8xf32> to vector<2x8x1xf32>
    %232 = vector.broadcast %231 : vector<2x8x1xf32> to vector<2x8x8xf32>
    %233 = arith.subf %229, %232 : vector<2x8x8xf32>
    %234 = math.exp %233 : vector<2x8x8xf32>
    %cst_92 = arith.constant dense<0.000000e+00> : vector<2x8xf32>
    %235 = vector.multi_reduction <add>, %234, %cst_92 [2] : vector<2x8x8xf32> to vector<2x8xf32>
    %236 = vector.shape_cast %235 : vector<2x8xf32> to vector<2x8x1xf32>
    %237 = tpu.reciprocal %236 {approx = true} : vector<2x8x1xf32> -> vector<2x8x1xf32>
    %238 = vector.broadcast %237 : vector<2x8x1xf32> to vector<2x8x8xf32>
    %239 = arith.mulf %234, %238 : vector<2x8x8xf32>
    "tpu.trace_start"() <{level = 10 : i32, message = "bqk,bkd->bqd"}> : () -> ()
    %cst_93 = arith.constant dense<0.000000e+00> : vector<2x8x8xf32>
    %240 = tpu.matmul %239, %227, %cst_93 {dimension_numbers = #tpu.dot_dimension_numbers<[2], [1], [1], [2], [0, 0, 0, 1, 1, 2], [0], [0]>} : vector<2x8x8xf32>, vector<2x8x8xf32>, vector<2x8x8xf32> -> vector<2x8x8xf32>
    "tpu.trace_stop"() : () -> ()
    %241 = tpu.concatenate %192, %208, %224, %240 in 2 : vector<2x8x8xf32>, vector<2x8x8xf32>, vector<2x8x8xf32>, vector<2x8x8xf32> -> vector<2x8x32xf32>
    %242 = vector.shape_cast %241 : vector<2x8x32xf32> to vector<16x32xf32>
    %c1_94 = arith.constant 1 : index
    %c0_95 = arith.constant 0 : index
    %c0_96 = arith.constant 0 : index
    %243 = vector.load %arg4[%c1_94, %c0_95, %c0_96] : memref<2x32x32xf32, #tpu.memory_space<vmem>>, vector<1x32x32xf32>
    %244 = vector.shape_cast %243 : vector<1x32x32xf32> to vector<32x32xf32>
    %cst_97 = arith.constant dense<0.000000e+00> : vector<16x32xf32>
    %245 = tpu.matmul %242, %244, %cst_97 {dimension_numbers = #tpu.dot_dimension_numbers<[1], [0], [0], [1], [0, 0, 1, 1], [], []>} : vector<16x32xf32>, vector<32x32xf32>, vector<16x32xf32> -> vector<16x32xf32>
    %c1_98 = arith.constant 1 : index
    %c0_99 = arith.constant 0 : index
    %c0_100 = arith.constant 0 : index
    %246 = vector.load %arg5[%c1_98, %c0_99, %c0_100] : memref<2x1x32xf32, #tpu.memory_space<vmem>>, vector<1x1x32xf32>
    %247 = vector.shape_cast %246 : vector<1x1x32xf32> to vector<1x32xf32>
    %248 = vector.broadcast %247 : vector<1x32xf32> to vector<16x32xf32>
    %249 = arith.addf %245, %248 : vector<16x32xf32>
    %250 = arith.addf %161, %249 : vector<16x32xf32>
    %c1_101 = arith.constant 1 : index
    %c0_102 = arith.constant 0 : index
    %c0_103 = arith.constant 0 : index
    %251 = vector.load %arg10[%c1_101, %c0_102, %c0_103] : memref<2x1x32xf32, #tpu.memory_space<vmem>>, vector<1x1x32xf32>
    %252 = vector.shape_cast %251 : vector<1x1x32xf32> to vector<1x32xf32>
    %c1_104 = arith.constant 1 : index
    %c0_105 = arith.constant 0 : index
    %c0_106 = arith.constant 0 : index
    %253 = vector.load %arg11[%c1_104, %c0_105, %c0_106] : memref<2x1x32xf32, #tpu.memory_space<vmem>>, vector<1x1x32xf32>
    %254 = vector.shape_cast %253 : vector<1x1x32xf32> to vector<1x32xf32>
    %cst_107 = arith.constant dense<0.000000e+00> : vector<16xf32>
    %255 = vector.multi_reduction <add>, %250, %cst_107 [1] : vector<16x32xf32> to vector<16xf32>
    %256 = vector.shape_cast %255 : vector<16xf32> to vector<16x1xf32>
    %cst_108 = arith.constant 3.200000e+01 : f32
    %257 = vector.broadcast %cst_108 : f32 to vector<16x1xf32>
    %258 = arith.divf %256, %257 : vector<16x1xf32>
    %259 = vector.broadcast %258 : vector<16x1xf32> to vector<16x32xf32>
    %260 = arith.subf %250, %259 : vector<16x32xf32>
    %261 = arith.mulf %260, %260 : vector<16x32xf32>
    %cst_109 = arith.constant dense<0.000000e+00> : vector<16xf32>
    %262 = vector.multi_reduction <add>, %261, %cst_109 [1] : vector<16x32xf32> to vector<16xf32>
    %263 = vector.shape_cast %262 : vector<16xf32> to vector<16x1xf32>
    %cst_110 = arith.constant 3.200000e+01 : f32
    %264 = vector.broadcast %cst_110 : f32 to vector<16x1xf32>
    %265 = arith.divf %263, %264 : vector<16x1xf32>
    %266 = vector.broadcast %258 : vector<16x1xf32> to vector<16x32xf32>
    %267 = arith.subf %250, %266 : vector<16x32xf32>
    %cst_111 = arith.constant 9.99999974E-6 : f32
    %268 = vector.broadcast %cst_111 : f32 to vector<16x1xf32>
    %269 = arith.addf %265, %268 : vector<16x1xf32>
    %270 = math.rsqrt %269 : vector<16x1xf32>
    %271 = vector.broadcast %270 : vector<16x1xf32> to vector<16x32xf32>
    %272 = arith.mulf %267, %271 : vector<16x32xf32>
    %273 = vector.broadcast %252 : vector<1x32xf32> to vector<16x32xf32>
    %274 = arith.mulf %272, %273 : vector<16x32xf32>
    %275 = vector.broadcast %254 : vector<1x32xf32> to vector<16x32xf32>
    %276 = arith.addf %274, %275 : vector<16x32xf32>
    %c1_112 = arith.constant 1 : index
    %c0_113 = arith.constant 0 : index
    %c0_114 = arith.constant 0 : index
    %277 = vector.load %arg6[%c1_112, %c0_113, %c0_114] : memref<2x32x64xf32, #tpu.memory_space<vmem>>, vector<1x32x64xf32>
    %278 = vector.shape_cast %277 : vector<1x32x64xf32> to vector<32x64xf32>
    %cst_115 = arith.constant dense<0.000000e+00> : vector<16x64xf32>
    %279 = tpu.matmul %276, %278, %cst_115 {dimension_numbers = #tpu.dot_dimension_numbers<[1], [0], [0], [1], [0, 0, 1, 1], [], []>} : vector<16x32xf32>, vector<32x64xf32>, vector<16x64xf32> -> vector<16x64xf32>
    %c1_116 = arith.constant 1 : index
    %c0_117 = arith.constant 0 : index
    %c0_118 = arith.constant 0 : index
    %280 = vector.load %arg7[%c1_116, %c0_117, %c0_118] : memref<2x1x64xf32, #tpu.memory_space<vmem>>, vector<1x1x64xf32>
    %281 = vector.shape_cast %280 : vector<1x1x64xf32> to vector<1x64xf32>
    %282 = vector.broadcast %281 : vector<1x64xf32> to vector<16x64xf32>
    %283 = arith.addf %279, %282 : vector<16x64xf32>
    %cst_119 = arith.constant 0.000000e+00 : f32
    %284 = vector.broadcast %cst_119 : f32 to vector<16x64xf32>
    %285 = arith.maximumf %283, %284 : vector<16x64xf32>
    %c1_120 = arith.constant 1 : index
    %c0_121 = arith.constant 0 : index
    %c0_122 = arith.constant 0 : index
    %286 = vector.load %arg8[%c1_120, %c0_121, %c0_122] : memref<2x64x32xf32, #tpu.memory_space<vmem>>, vector<1x64x32xf32>
    %287 = vector.shape_cast %286 : vector<1x64x32xf32> to vector<64x32xf32>
    %cst_123 = arith.constant dense<0.000000e+00> : vector<16x32xf32>
    %288 = tpu.matmul %285, %287, %cst_123 {dimension_numbers = #tpu.dot_dimension_numbers<[1], [0], [0], [1], [0, 0, 1, 1], [], []>} : vector<16x64xf32>, vector<64x32xf32>, vector<16x32xf32> -> vector<16x32xf32>
    %c1_124 = arith.constant 1 : index
    %c0_125 = arith.constant 0 : index
    %c0_126 = arith.constant 0 : index
    %289 = vector.load %arg9[%c1_124, %c0_125, %c0_126] : memref<2x1x32xf32, #tpu.memory_space<vmem>>, vector<1x1x32xf32>
    %290 = vector.shape_cast %289 : vector<1x1x32xf32> to vector<1x32xf32>
    %291 = vector.broadcast %290 : vector<1x32xf32> to vector<16x32xf32>
    %292 = arith.addf %288, %291 : vector<16x32xf32>
    %293 = arith.addf %276, %292 : vector<16x32xf32>
    %c1_127 = arith.constant 1 : index
    %c0_128 = arith.constant 0 : index
    %c0_129 = arith.constant 0 : index
    %294 = vector.load %arg12[%c1_127, %c0_128, %c0_129] : memref<2x1x32xf32, #tpu.memory_space<vmem>>, vector<1x1x32xf32>
    %295 = vector.shape_cast %294 : vector<1x1x32xf32> to vector<1x32xf32>
    %c1_130 = arith.constant 1 : index
    %c0_131 = arith.constant 0 : index
    %c0_132 = arith.constant 0 : index
    %296 = vector.load %arg13[%c1_130, %c0_131, %c0_132] : memref<2x1x32xf32, #tpu.memory_space<vmem>>, vector<1x1x32xf32>
    %297 = vector.shape_cast %296 : vector<1x1x32xf32> to vector<1x32xf32>
    %cst_133 = arith.constant dense<0.000000e+00> : vector<16xf32>
    %298 = vector.multi_reduction <add>, %293, %cst_133 [1] : vector<16x32xf32> to vector<16xf32>
    %299 = vector.shape_cast %298 : vector<16xf32> to vector<16x1xf32>
    %cst_134 = arith.constant 3.200000e+01 : f32
    %300 = vector.broadcast %cst_134 : f32 to vector<16x1xf32>
    %301 = arith.divf %299, %300 : vector<16x1xf32>
    %302 = vector.broadcast %301 : vector<16x1xf32> to vector<16x32xf32>
    %303 = arith.subf %293, %302 : vector<16x32xf32>
    %304 = arith.mulf %303, %303 : vector<16x32xf32>
    %cst_135 = arith.constant dense<0.000000e+00> : vector<16xf32>
    %305 = vector.multi_reduction <add>, %304, %cst_135 [1] : vector<16x32xf32> to vector<16xf32>
    %306 = vector.shape_cast %305 : vector<16xf32> to vector<16x1xf32>
    %cst_136 = arith.constant 3.200000e+01 : f32
    %307 = vector.broadcast %cst_136 : f32 to vector<16x1xf32>
    %308 = arith.divf %306, %307 : vector<16x1xf32>
    %309 = vector.broadcast %301 : vector<16x1xf32> to vector<16x32xf32>
    %310 = arith.subf %293, %309 : vector<16x32xf32>
    %cst_137 = arith.constant 9.99999974E-6 : f32
    %311 = vector.broadcast %cst_137 : f32 to vector<16x1xf32>
    %312 = arith.addf %308, %311 : vector<16x1xf32>
    %313 = math.rsqrt %312 : vector<16x1xf32>
    %314 = vector.broadcast %313 : vector<16x1xf32> to vector<16x32xf32>
    %315 = arith.mulf %310, %314 : vector<16x32xf32>
    %316 = vector.broadcast %295 : vector<1x32xf32> to vector<16x32xf32>
    %317 = arith.mulf %315, %316 : vector<16x32xf32>
    %318 = vector.broadcast %297 : vector<1x32xf32> to vector<16x32xf32>
    %319 = arith.addf %317, %318 : vector<16x32xf32>
    %c0_138 = arith.constant 0 : index
    %c0_139 = arith.constant 0 : index
    %320 = vector.load %arg14[%c0_138, %c0_139] : memref<1x32xf32, #tpu.memory_space<vmem>>, vector<1x32xf32>
    %c0_140 = arith.constant 0 : index
    %c0_141 = arith.constant 0 : index
    %321 = vector.load %arg15[%c0_140, %c0_141] : memref<1x32xf32, #tpu.memory_space<vmem>>, vector<1x32xf32>
    %cst_142 = arith.constant dense<0.000000e+00> : vector<16xf32>
    %322 = vector.multi_reduction <add>, %319, %cst_142 [1] : vector<16x32xf32> to vector<16xf32>
    %323 = vector.shape_cast %322 : vector<16xf32> to vector<16x1xf32>
    %cst_143 = arith.constant 3.200000e+01 : f32
    %324 = vector.broadcast %cst_143 : f32 to vector<16x1xf32>
    %325 = arith.divf %323, %324 : vector<16x1xf32>
    %326 = vector.broadcast %325 : vector<16x1xf32> to vector<16x32xf32>
    %327 = arith.subf %319, %326 : vector<16x32xf32>
    %328 = arith.mulf %327, %327 : vector<16x32xf32>
    %cst_144 = arith.constant dense<0.000000e+00> : vector<16xf32>
    %329 = vector.multi_reduction <add>, %328, %cst_144 [1] : vector<16x32xf32> to vector<16xf32>
    %330 = vector.shape_cast %329 : vector<16xf32> to vector<16x1xf32>
    %cst_145 = arith.constant 3.200000e+01 : f32
    %331 = vector.broadcast %cst_145 : f32 to vector<16x1xf32>
    %332 = arith.divf %330, %331 : vector<16x1xf32>
    %333 = vector.broadcast %325 : vector<16x1xf32> to vector<16x32xf32>
    %334 = arith.subf %319, %333 : vector<16x32xf32>
    %cst_146 = arith.constant 9.99999974E-6 : f32
    %335 = vector.broadcast %cst_146 : f32 to vector<16x1xf32>
    %336 = arith.addf %332, %335 : vector<16x1xf32>
    %337 = math.rsqrt %336 : vector<16x1xf32>
    %338 = vector.broadcast %337 : vector<16x1xf32> to vector<16x32xf32>
    %339 = arith.mulf %334, %338 : vector<16x32xf32>
    %340 = vector.broadcast %320 : vector<1x32xf32> to vector<16x32xf32>
    %341 = arith.mulf %339, %340 : vector<16x32xf32>
    %342 = vector.broadcast %321 : vector<1x32xf32> to vector<16x32xf32>
    %343 = arith.addf %341, %342 : vector<16x32xf32>
    %c0_147 = arith.constant 0 : index
    %c0_148 = arith.constant 0 : index
    %344 = vector.load %arg16[%c0_147, %c0_148] : memref<16x32xf32, #tpu.memory_space<vmem>>, vector<16x32xf32>
    tpu.vector_store %arg16[%c0_147, %c0_148], %343 {strides = array<i32>} : memref<16x32xf32, #tpu.memory_space<vmem>>, vector<16x32xf32>,
    return
  }
}

</mosaic_0001>

<bundles_post_ra>
// kernel: tpu_custom_call.1
= control target key start
LH: loop header
LB: loop body
LE: loop exit
PB: predicated region body
PF: predicated region fallthrough
CT: control target
= control target key end

     0   :  { %s2881_s0 = inlined_call_operand.hbm [shape: f32[16,32], index: 0, kind: input, shape index: {}]   ;;  %s2882_s1 = inlined_call_operand.hbm [shape: f32[2,1,8], index: 1, kind: input, shape index: {}]   ;;  %s2883_s2 = inlined_call_operand.vmem [shape: f32[2,32,96], index: 2, kind: input, shape index: {}]   ;;  %s2884_s3 = inlined_call_operand.vmem [shape: f32[2,1,96], index: 3, kind: input, shape index: {}]   ;;  %s2885_s4 = inlined_call_operand.vmem [shape: f32[2,32,32], index: 4, kind: input, shape index: {}]   ;;  %s2886_s5 = inlined_call_operand.hbm [shape: f32[2,1,32], index: 5, kind: input, shape index: {}]   ;;  %s2887_s6 = inlined_call_operand.vmem [shape: f32[2,32,64], index: 6, kind: input, shape index: {}]   ;;  %s2888_s7 = inlined_call_operand.vmem [shape: f32[2,1,64], index: 7, kind: input, shape index: {}]   ;;  %s2889_s8 = inlined_call_operand.vmem [shape: f32[2,64,32], index: 8, kind: input, shape index: {}]   ;;  %s2890_s9 = inlined_call_operand.vmem [shape: f32[2,1,32], index: 9, kind: input, shape index: {}]   ;;  %s2891_s10 = inlined_call_operand.vmem [shape: f32[2,1,32], index: 10, kind: input, shape index: {}]   ;;  %s2892_s11 = inlined_call_operand.hbm [shape: f32[2,1,32], index: 11, kind: input, shape index: {}]   ;;  %s2893_s12 = inlined_call_operand.vmem [shape: f32[2,1,32], index: 12, kind: input, shape index: {}]   ;;  %s2894_s13 = inlined_call_operand.hbm [shape: f32[2,1,32], index: 13, kind: input, shape index: {}]   ;;  %s2895_s14 = inlined_call_operand.vmem [shape: f32[1,32], index: 14, kind: input, shape index: {}]   ;;  %s2896_s15 = inlined_call_operand.vmem [shape: f32[1,32], index: 15, kind: input, shape index: {}]   ;;  %s2897_s16 = inlined_call_operand.hbm [shape: f32[16,32], index: 16, kind: output, shape index: {}]  }
   0x1   :  { %2904 = sst [smem:[#allocation16_spill]] %s2881_s0 }
   0x2   :  { %21 = vsyncpa [#allocation3], 0 }
   0x3   :  { %22 = vsyncpa [#allocation6], 0 }
   0x4   :  { %23 = vsyncpa [#allocation9], 0  ;;  %s42_s23 = sshll.u32 %s2882_s1, 4  ;;  %s43_s23 = int_to_ptr.hbm [resolvable:$true] %s42_s23 }
   0x5   :  { %24 = vsyncpa [#allocation4], 0  ;;  %s2289_s24 = smov [#allocation5]   ;;  %s84_s28 = sshll.u32 %s2892_s11, 4  ;;  %s85_s28 = int_to_ptr.hbm [resolvable:$true] %s84_s28 }
   0x6   :  { %s44_s25 = sshll.u32 %s2289_s24, 4  ;;  %s2902_s29 = smov 16   ;;  %s45_s25 = int_to_ptr.vmem [resolvable:$true] %s44_s25 }
   0x7   :  { %s2291_s30 = smov 1   ;;  %s2292_s0 = smov [#allocation8]  }
   0x8   :  { %50 = dma.hbm_to_vmem [thread:$0]  %s43_s23, 32, %s45_s25, [#allocation6], %s2902_s29, %s2902_s29, %s2291_s30  }
   0x9   :  { %s86_s17 = sshll.u32 %s2292_s0, 4  ;;  %s2905_s19 = sld [smem:[#allocation16_spill]]  ;;  %s87_s17 = int_to_ptr.vmem [resolvable:$true] %s86_s17 }
   0xa   :  { %92 = dma.hbm_to_vmem [thread:$0]  %s85_s28, 32, %s87_s17, [#allocation9], %s2902_s29, %s2902_s29, %s2291_s30  }
   0xb   :  { %s2293_s11 = smov [#allocation2]   ;;  %s61_s23 = sshll.u32 %s2886_s5, 4  ;;  %s62_s23 = int_to_ptr.hbm [resolvable:$true] %s61_s23 }
   0xc   :  { %s31_s21 = sshll.u32 %s2293_s11, 4  ;;  %s2898_s25 = smov 128   ;;  %s32_s21 = int_to_ptr.vmem [resolvable:$true] %s31_s21 }
   0xd   :  { %s2899_s26 = smov 8   ;;  %s2296_s27 = smov [#allocation7]  }
   0xe   :  { %s63_s0 = sshll.u32 %s2296_s27, 4  ;;  %s99_s28 = sshll.u32 %s2894_s13, 4  ;;  %s64_s0 = int_to_ptr.vmem [resolvable:$true] %s63_s0  ;;  %s100_s28 = int_to_ptr.hbm [resolvable:$true] %s99_s28 }
   0xf   :  { %s29_s20 = sshll.u32 %s2905_s19, 4  ;;  %s2297_s5 = smov [#allocation10]   ;;  %s30_s20 = int_to_ptr.hbm [resolvable:$true] %s29_s20 }
  0x10   :  { %37 = dma.hbm_to_vmem [thread:$0]  %s30_s20, 256, %s32_s21, [#allocation3], %s2898_s25, %s2898_s25, %s2899_s26  }
  0x11   :  { %69 = dma.hbm_to_vmem [thread:$0]  %s62_s23, 32, %s64_s0, [#allocation6], %s2902_s29, %s2902_s29, %s2291_s30  }
  0x12   :  { %s101_s17 = sshll.u32 %s2297_s5, 4  ;;  %s102_s17 = int_to_ptr.vmem [resolvable:$true] %s101_s17 }
  0x13   :  { %107 = dma.hbm_to_vmem [thread:$0]  %s100_s28, 32, %s102_s17, [#allocation9], %s2902_s29, %s2902_s29, %s2291_s30  }
  0x14   :  { %2281 = dma.done.wait [#allocation3], 256  }
  0x15   :  { %2282 = vsyncadd [#allocation3], 4294967040 }
  0x16   :  { %2283 = dma.done.wait [#allocation6], 64  }
  0x17   :  { %2284 = vsyncadd [#allocation6], 4294967232 }
  0x18   :  { %2285 = dma.done.wait [#allocation9], 64  }
  0x19   :  { %2286 = vsyncadd [#allocation9], 4294967232  ;;  %v145_v0 = vld [vmem:[%s2883_s2 + $0x18] sm:$0xff]  ;;  %v144_v1 = vld [vmem:[%s2883_s2 + $0x10] sm:$0xff]  ;;  %vm150_vm0 = vcmask 261120   ;;  %s2298_s0 = smov 88  }
  0x1a   :  { %169 = vmatpush.msra.mxu0 %v145_v0  ;;  %v143_v2 = vld [vmem:[%s2883_s2 + $0x8] sm:$0xff]  ;;  %v142_v3 = vld [vmem:[%s2883_s2] sm:$0xff]  ;;  %s2299_s18 = smov 96   ;;  %s2300_s1 = smov 80   ;;  %vm185_vm1 = vcmask 64512   ;;  %vm729_vm2 = vcmask 130048  }
  0x1b   :  { %v2439_v4 = vld [vmem:[#allocation2] sm:$0xff]  ;;  %v2443_v5 = vld [vmem:[#allocation2 + $0x8] sm:$0xff]  ;;  %s2301_s28 = smov 120   ;;  %s2302_s5 = smov 72   ;;  %v2494_v27 = vld [vmem:[#allocation5] ss:$0 sm:$0xff] }
  0x1c   :  { %170 = vmatpush.msra.mxu0 %v144_v1  ;;  %v2031_v6 = vld [vmem:[%s2884_s3] ss:$0 sm:$0xff]  ;;  %s2303_s17 = smov 112   ;;  %s2304_s13 = smov 104   ;;  %v2498_v31 = vld [vmem:[#allocation5 + $0x1] ss:$0 sm:$0xff] }
  0x1d   :  { %s2901_s19 = smov 56   ;;  %s2306_s20 = smov 64   ;;  %vm732_vm3 = vcmask 195584   ;;  %vm888_vm11 = vcmask 523264  }
  0x1e   :  { %171 = vmatpush.msra.mxu0 %v143_v2  ;;  %s2307_s11 = smov 48   ;;  %s2308_s21 = smov 40  }
  0x1f   :  { %s2309_s22 = smov 24  }
  0x20   :  { %172 = vmatpush.msra.mxu0 %v142_v3 }
  0x21   :  { %1889 = vmatmul.msk.f32.vlgmr.msra.gmra.mxu0 %vm150_vm0, %v2439_v4 }
  0x29   :  { %1890 = vmatmul.msk.f32.gmra.mxu0 %vm150_vm0, %v2443_v5 }
  0x9e   :  { %v174_v7 = vpop.f32.mrf.mxu0 }
  0x9f   :  { %v2450_v8 = vadd.f32 %v2031_v6, %v174_v7 }
  0xa1   :  { %315 = vrot.lane.b32.xlu2 %v2450_v8, %s2298_s0  ;;  %183 = vrot.lane.b32.xlu0 %v2450_v8, %s2299_s18  ;;  %v180_v12 = vmul.f32 0.35355338, %v2450_v8 }
  0xa6   :  { %v177_v9 = vpop.f32.mrf.mxu0 }
  0xa7   :  { %v2456_v10 = vadd.f32 %v2031_v6, %v177_v9 }
  0xa9   :  { %343 = vrot.lane.b32.xlu1 %v2456_v10, %s2298_s0  ;;  %445 = vrot.lane.b32.xlu2 %v2450_v8, %s2300_s1  ;;  %v181_v11 = vmul.f32 0.35355338, %v2456_v10  ;;  %v2006_v53 = vpack.i.bf16 %v2456_v10, %v2450_v8 }
  0xaa   :  { %212 = vrot.lane.b32.xlu0 %v2456_v10, %s2299_s18 }
  0xb1   :  { %341 = vrot.lane.b32.xlu1 %v181_v11, %s2301_s28  ;;  %575 = vrot.lane.b32.xlu2 %v2450_v8, %s2302_s5 }
  0xb2   :  { %313 = vrot.lane.b32.xlu0 %v180_v12, %s2301_s28 }
  0xb9   :  { %471 = vrot.lane.b32.xlu2 %v181_v11, %s2303_s17  ;;  %443 = vrot.lane.b32.xlu1 %v180_v12, %s2303_s17 }
  0xba   :  { %573 = vrot.lane.b32.xlu0 %v180_v12, %s2304_s13 }
  0xc1   :  { %473 = vrot.lane.b32.xlu1 %v2456_v10, %s2300_s1 }
  0xc2   :  { %603 = vrot.lane.b32.xlu0 %v2456_v10, %s2302_s5 }
  0xc9   :  { %601 = vrot.lane.b32.xlu1 %v181_v11, %s2304_s13 }
  0xfb   :  { %v316_v13 = vpop.permute.xlu2 %315 }
  0xfc   :  { %1897 = vmatpush.xpose.msk.msra.mxu1 %vm185_vm1, %v316_v13 }
 0x103   :  { %v446_v17 = vpop.permute.xlu2 %445 }
 0x10b   :  { %v576_v20 = vpop.permute.xlu2 %575 }
 0x113   :  { %v184_v14 = vpop.permute.xlu0 %183  ;;  %v472_v25 = vpop.permute.xlu2 %471 }
 0x114   :  { %1891 = vmatpush.xpose.msk.msra.mxu2 %vm185_vm1, %v184_v14 }
 0x117   :  { %1892 = vmatmul.msk.f32.vlgmr.msra.gmra.mxu2 %vm185_vm1, %v180_v12 }
 0x11b   :  { %v344_v15 = vpop.permute.xlu1 %343 }
 0x11c   :  { %v213_v16 = vpop.permute.xlu0 %212 }
 0x11d   :  { %1893 = vmatpush.xpose.msk.msrb.mxu2 %vm185_vm1, %v213_v16 }
 0x120   :  { %1894 = vmatmul.msk.f32.vlgmr.msrb.gmra.mxu2 %vm185_vm1, %v181_v11 }
 0x121   :  { %1899 = vmatpush.xpose.msk.msra.mxu2 %vm185_vm1, %v344_v15 }
 0x123   :  { %v342_v18 = vpop.permute.xlu1 %341 }
 0x124   :  { %v314_v19 = vpop.permute.xlu0 %313 }
 0x125   :  { %1903 = vmatpush.xpose.msk.msrb.mxu2 %vm185_vm1, %v446_v17  ;;  %1898 = vmatmul.msk.f32.vlgmr.msra.gmra.mxu1 %vm185_vm1, %v314_v19 }
 0x128   :  { %1900 = vmatmul.msk.f32.vlgmr.msra.gmra.mxu2 %vm185_vm1, %v342_v18 }
 0x129   :  { %1909 = vmatpush.xpose.msk.msra.mxu2 %vm185_vm1, %v576_v20 }
 0x12b   :  { %v444_v21 = vpop.permute.xlu1 %443 }
 0x12c   :  { %v574_v22 = vpop.permute.xlu0 %573 }
 0x130   :  { %1904 = vmatmul.msk.f32.vlgmr.msrb.gmra.mxu2 %vm185_vm1, %v444_v21 }
 0x133   :  { %v474_v23 = vpop.permute.xlu1 %473 }
 0x134   :  { %v604_v24 = vpop.permute.xlu0 %603  ;;  %1905 = vmatpush.xpose.msk.msrb.mxu0 %vm185_vm1, %v474_v23 }
 0x137   :  { %1906 = vmatmul.msk.f32.vlgmr.msrb.gmra.mxu0 %vm185_vm1, %v472_v25 }
 0x138   :  { %1911 = vmatpush.xpose.msk.msra.mxu0 %vm185_vm1, %v604_v24  ;;  %1910 = vmatmul.msk.f32.vlgmr.msra.gmra.mxu2 %vm185_vm1, %v574_v22 }
 0x13b   :  { %v602_v26 = vpop.permute.xlu1 %601 }
 0x13f   :  { %1912 = vmatmul.msk.f32.vlgmr.msra.gmra.mxu0 %vm185_vm1, %v602_v26 }
 0x19a   :  { %v208_v28 = vpop.f32.mrf.mxu2 }
 0x19b   :  { %v209_v29 = vadd.f32 %v2494_v27, %v208_v28 }
 0x19d   :  { %v239_v30 = vsel %vm185_vm1, %v209_v29, -inf }
 0x19e   :  { %240 = vmax.xlane.f32.xlu2 %v239_v30 }
 0x1a2   :  { %v338_v32 = vpop.f32.mrf.mxu1 }
 0x1a3   :  { %v339_v33 = vadd.f32 %v2494_v27, %v338_v32  ;;  %v236_v34 = vpop.f32.mrf.mxu2 }
 0x1a4   :  { %v237_v35 = vadd.f32 %v2498_v31, %v236_v34 }
 0x1a5   :  { %v369_v36 = vsel %vm185_vm1, %v339_v33, -inf }
 0x1a6   :  { %370 = vmax.xlane.f32.xlu1 %v369_v36  ;;  %v242_v37 = vsel %vm185_vm1, %v237_v35, -inf }
 0x1a7   :  { %243 = vmax.xlane.f32.xlu0 %v242_v37 }
 0x1ab   :  { %v366_v38 = vpop.f32.mrf.mxu2 }
 0x1ac   :  { %v367_v49 = vadd.f32 %v2498_v31, %v366_v38 }
 0x1ae   :  { %v372_v50 = vsel %vm185_vm1, %v367_v49, -inf }
 0x1b3   :  { %v468_v39 = vpop.f32.mrf.mxu2 }
 0x1b4   :  { %v496_v40 = vpop.f32.mrf.mxu0  ;;  %v469_v51 = vadd.f32 %v2494_v27, %v468_v39 }
 0x1b5   :  { %v497_v41 = vadd.f32 %v2498_v31, %v496_v40 }
 0x1b6   :  { %v499_v52 = vsel %vm185_vm1, %v469_v51, -inf }
 0x1b7   :  { %v502_v42 = vsel %vm185_vm1, %v497_v41, -inf }
 0x1b8   :  { %503 = vmax.xlane.f32.xlu1 %v502_v42 }
 0x1bb   :  { %v598_v43 = vpop.f32.mrf.mxu2 }
 0x1bc   :  { %v2507_v44 = vadd.f32 %v2494_v27, %v598_v43  ;;  %v626_v45 = vpop.f32.mrf.mxu0 }
 0x1bd   :  { %v627_v46 = vadd.f32 %v2498_v31, %v626_v45 }
 0x1be   :  { %v629_v47 = vsel %vm185_vm1, %v2507_v44, -inf }
 0x1bf   :  { %630 = vmax.xlane.f32.xlu0 %v629_v47  ;;  %v632_v48 = vsel %vm185_vm1, %v627_v46, -inf }
 0x1c0   :  { %633 = vmax.xlane.f32.xlu2 %v632_v48 }
 0x1c8   :  { %373 = vmax.xlane.f32.xlu2 %v372_v50 }
 0x1d0   :  { %500 = vmax.xlane.f32.xlu2 %v499_v52 }
 0x1d3   :  { %2007 = vrot.lane.b32.xlu0 %v2006_v53, %s2901_s19 }
 0x1e8   :  { %2002 = vrot.lane.b32.xlu2 %v2006_v53, %s2306_s20 }
 0x1f0   :  { %521 = vrot.lane.b32.xlu2 %v2450_v8, %s2307_s11 }
 0x211   :  { %v241_v54 = vpop.xlane.xlu2 %240 }
 0x212   :  { %v245_v57 = vsub.f32 %v209_v29, %v241_v54 }
 0x214   :  { %v247_v59 = vmul.f32 1.442695, %v245_v57 }
 0x219   :  { %v371_v55 = vpop.xlane.xlu1 %370 }
 0x21a   :  { %v375_v56 = vsub.f32 %v339_v33, %v371_v55  ;;  %v244_v63 = vpop.xlane.xlu0 %243 }
 0x21b   :  { %v246_v3 = vsub.f32 %v237_v35, %v244_v63 }
 0x21c   :  { %v377_v58 = vmul.f32 1.442695, %v375_v56 }
 0x21d   :  { %v249_v7 = vmul.f32 1.442695, %v246_v3 }
 0x21e   :  { %2051 = vpow2.f32 %v377_v58 }
 0x21f   :  { %2053 = vpow2.f32 %v247_v59 }
 0x224   :  { %v2523_v60 = vpop.eup %2051 }
 0x225   :  { %v381_v61 = vsel %vm185_vm1, %v2523_v60, 0.0  ;;  %v2054_v62 = vpop.eup %2053 }
 0x226   :  { %382 = vadd.xlane.f32.xlu0 %v381_v61  ;;  %v251_v2 = vsel %vm185_vm1, %v2054_v62, 0.0 }
 0x22b   :  { %v504_v0 = vpop.xlane.xlu1 %503 }
 0x22c   :  { %v506_v1 = vsub.f32 %v497_v41, %v504_v0 }
 0x22e   :  { %v509_v6 = vmul.f32 1.442695, %v506_v1  ;;  %252 = vadd.xlane.f32.xlu0 %v251_v2 }
 0x230   :  { %2055 = vpow2.f32 %v509_v6 }
 0x231   :  { %2057 = vpow2.f32 %v249_v7 }
 0x232   :  { %v631_v18 = vpop.xlane.xlu0 %630 }
 0x233   :  { %v634_v9 = vpop.xlane.xlu2 %633  ;;  %v635_v28 = vsub.f32 %v2507_v44, %v631_v18  ;;  %v736_v18 = vld [vmem:[%s2885_s4 + $0x8] sm:$0xff] }
 0x234   :  { %v636_v11 = vsub.f32 %v627_v46, %v634_v9 }
 0x235   :  { %v637_v33 = vmul.f32 1.442695, %v635_v28 }
 0x236   :  { %v2528_v12 = vpop.eup %2055  ;;  %v639_v13 = vmul.f32 1.442695, %v636_v11 }
 0x237   :  { %v514_v14 = vsel %vm185_vm1, %v2528_v12, 0.0  ;;  %v2058_v16 = vpop.eup %2057 }
 0x238   :  { %2059 = vpow2.f32 %v639_v13  ;;  %515 = vadd.xlane.f32.xlu1 %v514_v14  ;;  %v254_v21 = vsel %vm185_vm1, %v2058_v16, 0.0 }
 0x23b   :  { %v374_v15 = vpop.xlane.xlu2 %373 }
 0x23c   :  { %v376_v17 = vsub.f32 %v367_v49, %v374_v15 }
 0x23e   :  { %v2532_v19 = vpop.eup %2059  ;;  %v379_v20 = vmul.f32 1.442695, %v376_v17  ;;  %v737_v17 = vld [vmem:[%s2885_s4 + $0x10] sm:$0xff] }
 0x23f   :  { %v644_v22 = vsel %vm185_vm1, %v2532_v19, 0.0 }
 0x240   :  { %2061 = vpow2.f32 %v379_v20  ;;  %255 = vadd.xlane.f32.xlu1 %v254_v21  ;;  %645 = vadd.xlane.f32.xlu2 %v644_v22 }
 0x242   :  { %651 = vrot.lane.b32.xlu0 %v2450_v8, %s2308_s21 }
 0x243   :  { %v501_v23 = vpop.xlane.xlu2 %500 }
 0x244   :  { %v505_v24 = vsub.f32 %v469_v51, %v501_v23 }
 0x245   :  { %v2008_v25 = vpop.permute.xlu0 %2007 }
 0x246   :  { %v2062_v26 = vpop.eup %2061  ;;  %v507_v29 = vmul.f32 1.442695, %v505_v24  ;;  %v2010_v30 = vunpack.i.h.bf16 %v2008_v25  ;;  %v2009_v44 = vunpack.i.l.bf16 %v2008_v25 }
 0x247   :  { %v384_v32 = vsel %vm185_vm1, %v2062_v26, 0.0 }
 0x248   :  { %2063 = vpow2.f32 %v507_v29  ;;  %438 = vmatpush.msrb.mxu1 %v2010_v30  ;;  %385 = vadd.xlane.f32.xlu1 %v384_v32 }
 0x249   :  { %2065 = vpow2.f32 %v637_v33 }
 0x24a   :  { %677 = vrot.lane.b32.xlu0 %v2456_v10, %s2308_s21 }
 0x24b   :  { %v2003_v34 = vpop.permute.xlu2 %2002 }
 0x24c   :  { %v2004_v35 = vunpack.i.l.bf16 %v2003_v34  ;;  %v2005_v8 = vunpack.i.h.bf16 %v2003_v34  ;;  %v2034_v34 = vld [vmem:[#allocation7] ss:$0 sm:$0xff] }
 0x24e   :  { %v2064_v36 = vpop.eup %2063  ;;  %282 = vmatpush.msra.mxu3 %v2004_v35 }
 0x24f   :  { %v511_v37 = vsel %vm185_vm1, %v2064_v36, 0.0  ;;  %v2066_v38 = vpop.eup %2065 }
 0x250   :  { %308 = vmatpush.msrb.mxu3 %v2005_v8  ;;  %512 = vadd.xlane.f32.xlu1 %v511_v37  ;;  %v641_v39 = vsel %vm185_vm1, %v2066_v38, 0.0 }
 0x253   :  { %v522_v50 = vpop.permute.xlu2 %521 }
 0x258   :  { %642 = vadd.xlane.f32.xlu1 %v641_v39 }
 0x271   :  { %547 = vrot.lane.b32.xlu1 %v2456_v10, %s2307_s11 }
 0x299   :  { %v383_v40 = vpop.xlane.xlu0 %382 }
 0x2a1   :  { %v253_v41 = vpop.xlane.xlu0 %252 }
 0x2a2   :  { %2067 = vrcp.f32 %v253_v41 }
 0x2a8   :  { %v2068_v42 = vpop.eup %2067 }
 0x2a9   :  { %v259_v43 = vmul.f32 %v2068_v42, %v2054_v62  ;;  %v2310_v42 = vmov 32.0  }
 0x2ab   :  { %1895 = vmatmul.msk.f32.vlgmr.msra.gmra.mxu3 %vm185_vm1, %v259_v43  ;;  %v516_v45 = vpop.xlane.xlu1 %515 }
 0x2ac   :  { %412 = vmatpush.msra.mxu3 %v2009_v44 }
 0x2b3   :  { %v256_v46 = vpop.xlane.xlu1 %255 }
 0x2b4   :  { %2069 = vrcp.f32 %v256_v46  ;;  %v652_v55 = vpop.permute.xlu0 %651 }
 0x2b5   :  { %2071 = vrcp.f32 %v383_v40 }
 0x2ba   :  { %v2070_v47 = vpop.eup %2069 }
 0x2bb   :  { %v386_v48 = vpop.xlane.xlu1 %385  ;;  %v260_v49 = vmul.f32 %v2070_v47, %v2058_v16  ;;  %v2072_v10 = vpop.eup %2071  ;;  %v738_v16 = vld [vmem:[%s2885_s4 + $0x18] sm:$0xff] }
 0x2bc   :  { %2073 = vrcp.f32 %v386_v48  ;;  %v389_v52 = vmul.f32 %v2072_v10, %v2523_v60  ;;  %v646_v60 = vpop.xlane.xlu2 %645  ;;  %v678_v1 = vpop.permute.xlu0 %677  ;;  %761 = vmatpush.msrb.mxu2 %v738_v16 }
 0x2bd   :  { %1896 = vmatmul.msk.f32.vlgmr.msrb.gmra.mxu3 %vm185_vm1, %v260_v49 }
 0x2be   :  { %542 = vmatpush.msrb.mxu3 %v522_v50  ;;  %762 = vmatpush.msrb.mxu2 %v737_v17  ;;  %v879_v17 = vld [vmem:[%s2889_s8 + $0x18] sm:$0xff] }
 0x2c0   :  { %763 = vmatpush.msrb.mxu2 %v736_v18 }
 0x2c2   :  { %v2074_v51 = vpop.eup %2073 }
 0x2c3   :  { %v513_v53 = vpop.xlane.xlu1 %512  ;;  %v390_v54 = vmul.f32 %v2074_v51, %v2062_v26 }
 0x2c4   :  { %2075 = vrcp.f32 %v513_v53 }
 0x2c5   :  { %1901 = vmatmul.msk.f32.vlgmr.msra.gmra.mxu3 %vm185_vm1, %v389_v52  ;;  %1902 = vmatmul.msk.f32.vlgmr.msrb.gmra.mxu1 %vm185_vm1, %v390_v54 }
 0x2c6   :  { %672 = vmatpush.msra.mxu3 %v652_v55 }
 0x2ca   :  { %v2076_v56 = vpop.eup %2075 }
 0x2cb   :  { %v519_v57 = vmul.f32 %v2076_v56, %v2064_v36  ;;  %v643_v58 = vpop.xlane.xlu1 %642  ;;  %v840_v56 = vld [vmem:[%s2887_s6 + $0x18] sm:$0xff] }
 0x2cc   :  { %2077 = vrcp.f32 %v643_v58  ;;  %863 = vmatpush.msrb.mxu0 %v840_v56  ;;  %v838_v58 = vld [vmem:[%s2887_s6 + $0x8] sm:$0xff] }
 0x2cd   :  { %1907 = vmatmul.msk.f32.vlgmr.msrb.gmra.mxu3 %vm185_vm1, %v519_v57  ;;  %2079 = vrcp.f32 %v516_v45  ;;  %v839_v57 = vld [vmem:[%s2887_s6 + $0x10] sm:$0xff] }
 0x2ce   :  { %2081 = vrcp.f32 %v646_v60  ;;  %864 = vmatpush.msrb.mxu0 %v839_v57 }
 0x2cf   :  { %2083 = vrcp.f32 %v2310_v42 }
 0x2d0   :  { %865 = vmatpush.msrb.mxu0 %v838_v58 }
 0x2d2   :  { %v2078_v59 = vpop.eup %2077 }
 0x2d3   :  { %v649_v61 = vmul.f32 %v2078_v59, %v2066_v38  ;;  %v2080_v62 = vpop.eup %2079  ;;  %v837_v59 = vld [vmem:[%s2887_s6] sm:$0xff] }
 0x2d4   :  { %v520_v63 = vmul.f32 %v2080_v62, %v2528_v12  ;;  %v2082_v2 = vpop.eup %2081  ;;  %866 = vmatpush.msrb.mxu0 %v837_v59 }
 0x2d5   :  { %1913 = vmatmul.msk.f32.vlgmr.msra.gmra.mxu3 %vm185_vm1, %v649_v61  ;;  %v650_v3 = vmul.f32 %v2082_v2, %v2532_v19  ;;  %v735_v19 = vld [vmem:[%s2885_s4] sm:$0xff]  ;;  %v2084_v43 = vpop.eup %2083  ;;  %v883_v2 = vld [vmem:[%s2889_s8 + $0x38] sm:$0xff] }
 0x2d6   :  { %764 = vmatpush.msrb.mxu2 %v735_v19  ;;  %v783_v44 = vmul.f32 32.0, %v2084_v43  ;;  %vm787_vm4 = vweird.f32 %v2084_v43  ;;  %903 = vmatpush.msrb.mxu3 %v883_v2 }
 0x2d8   :  { %v784_v45 = vsub.f32 1.0, %v783_v44  ;;  %v2038_v44 = vld [vmem:[%s2890_s9] ss:$0 sm:$0xff] }
 0x2da   :  { %v785_v46 = vmul.f32 %v2084_v43, %v784_v45 }
 0x2dc   :  { %v786_v47 = vadd.f32 %v2084_v43, %v785_v46 }
 0x2de   :  { %v2588_v48 = vsel %vm787_vm4, %v2084_v43, %v786_v47 }
 0x2e3   :  { %v548_v0 = vpop.permute.xlu1 %547 }
 0x2e4   :  { %568 = vmatpush.msra.mxu1 %v548_v0 }
 0x2e5   :  { %1908 = vmatmul.msk.f32.vlgmr.msra.gmra.mxu1 %vm185_vm1, %v520_v63 }
 0x2e6   :  { %698 = vmatpush.msrb.mxu1 %v678_v1 }
 0x2ed   :  { %1914 = vmatmul.msk.f32.vlgmr.msrb.gmra.mxu1 %vm185_vm1, %v650_v3  ;;  %v882_v3 = vld [vmem:[%s2889_s8 + $0x30] sm:$0xff] }
 0x2ee   :  { %904 = vmatpush.msrb.mxu3 %v882_v3 }
 0x32e   :  { %v284_v6 = vpop.f32.mrf.mxu3 }
 0x340   :  { %v310_v7 = vpop.f32.mrf.mxu3 }
 0x342   :  { %v440_v12 = vpop.f32.mrf.mxu1 }
 0x348   :  { %v414_v9 = vpop.f32.mrf.mxu3 }
 0x349   :  { %705 = vrot.lane.b32.xlu0 %v414_v9, %s2899_s26 }
 0x350   :  { %v544_v11 = vpop.f32.mrf.mxu3 }
 0x351   :  { %713 = vrot.lane.b32.xlu0 %v544_v11, %s2902_s29 }
 0x358   :  { %v674_v13 = vpop.f32.mrf.mxu3 }
 0x359   :  { %707 = vrot.lane.b32.xlu0 %v440_v12, %s2899_s26  ;;  %721 = vrot.lane.b32.xlu1 %v674_v13, %s2309_s22  ;;  %v880_v13 = vld [vmem:[%s2889_s8 + $0x20] sm:$0xff] }
 0x362   :  { %v570_v14 = vpop.f32.mrf.mxu1 }
 0x363   :  { %715 = vrot.lane.b32.xlu1 %v570_v14, %s2902_s29 }
 0x36a   :  { %v700_v15 = vpop.f32.mrf.mxu1 }
 0x36b   :  { %723 = vrot.lane.b32.xlu0 %v700_v15, %s2309_s22  ;;  %v2035_v15 = vld [vmem:[%s2891_s10] ss:$0 sm:$0xff] }
 0x3bb   :  { %v706_v20 = vpop.permute.xlu0 %705 }
 0x3bc   :  { %v727_v22 = vsel %vm185_vm1, %v284_v6, %v706_v20  ;;  %v2036_v20 = vld [vmem:[#allocation8] ss:$0 sm:$0xff] }
 0x3c3   :  { %v714_v21 = vpop.permute.xlu0 %713 }
 0x3c4   :  { %v730_v23 = vsel %vm729_vm2, %v727_v22, %v714_v21 }
 0x3cb   :  { %v722_v24 = vpop.permute.xlu1 %721  ;;  %v708_v26 = vpop.permute.xlu0 %707 }
 0x3cc   :  { %v733_v25 = vsel %vm732_vm3, %v730_v23, %v722_v24  ;;  %v728_v29 = vsel %vm185_vm1, %v310_v7, %v708_v26  ;;  %v881_v7 = vld [vmem:[%s2889_s8 + $0x28] sm:$0xff] }
 0x3cd   :  { %1915 = vmatmul.msk.f32.vlgmr.msrb.gmra.mxu2 %vm150_vm0, %v733_v25  ;;  %905 = vmatpush.msrb.mxu3 %v881_v7 }
 0x3cf   :  { %906 = vmatpush.msrb.mxu3 %v880_v13 }
 0x3d1   :  { %907 = vmatpush.msrb.mxu3 %v879_v17 }
 0x3d5   :  { %v716_v28 = vpop.permute.xlu1 %715 }
 0x3d6   :  { %v731_v30 = vsel %vm729_vm2, %v728_v29, %v716_v28 }
 0x3dd   :  { %v724_v32 = vpop.permute.xlu0 %723 }
 0x3de   :  { %v734_v33 = vsel %vm732_vm3, %v731_v30, %v724_v32 }
 0x3df   :  { %1916 = vmatmul.msk.f32.gmra.mxu2 %vm150_vm0, %v734_v33 }
 0x450   :  { %v766_v35 = vpop.f32.mrf.mxu2 }
 0x451   :  { %v767_v8 = vadd.f32 %v2034_v34, %v766_v35  ;;  %v878_v35 = vld [vmem:[%s2889_s8 + $0x10] sm:$0xff] }
 0x452   :  { %908 = vmatpush.msrb.mxu3 %v878_v35  ;;  %v2041_v35 = vld [vmem:[%s2884_s3 + $0x1] ss:$0 sm:$0xff]  ;;  %s2906_s3 = smov 56  }
 0x453   :  { %v772_v36 = vadd.f32 %v767_v8, %v2439_v4  ;;  %v877_v8 = vld [vmem:[%s2889_s8 + $0x8] sm:$0xff] }
 0x454   :  { %909 = vmatpush.msrb.mxu3 %v877_v8 }
 0x455   :  { %v776_v37 = vsel %vm150_vm0, %v772_v36, 0.0 }
 0x456   :  { %777 = vadd.xlane.f32.xlu2 %v776_v37  ;;  %v2037_v37 = vld [vmem:[%s2888_s7] ss:$0 sm:$0xff] }
 0x462   :  { %v769_v38 = vpop.f32.mrf.mxu2 }
 0x463   :  { %v770_v39 = vadd.f32 %v2034_v34, %v769_v38 }
 0x465   :  { %v773_v40 = vadd.f32 %v770_v39, %v2443_v5 }
 0x467   :  { %v779_v41 = vsel %vm150_vm0, %v773_v40, 0.0 }
 0x468   :  { %780 = vadd.xlane.f32.xlu1 %v779_v41 }
 0x4c9   :  { %v778_v4 = vpop.xlane.xlu2 %777 }
 0x4ca   :  { %v789_v49 = vmul.f32 %v2588_v48, %v778_v4 }
 0x4cc   :  { %v791_v50 = vsub.f32 %v772_v36, %v789_v49  ;;  %v876_v36 = vld [vmem:[%s2889_s8] sm:$0xff] }
 0x4cd   :  { %910 = vmatpush.msrb.mxu3 %v876_v36 }
 0x4ce   :  { %v793_v10 = vmul.f32 %v791_v50, %v791_v50 }
 0x4d0   :  { %v795_v5 = vsel %vm150_vm0, %v793_v10, 0.0 }
 0x4d1   :  { %796 = vadd.xlane.f32.xlu0 %v795_v5 }
 0x4db   :  { %v781_v51 = vpop.xlane.xlu1 %780 }
 0x4dc   :  { %v790_v52 = vmul.f32 %v2588_v48, %v781_v51 }
 0x4de   :  { %v792_v53 = vsub.f32 %v773_v40, %v790_v52 }
 0x4e0   :  { %v794_v54 = vmul.f32 %v792_v53, %v792_v53 }
 0x4e2   :  { %v798_v55 = vsel %vm150_vm0, %v794_v54, 0.0 }
 0x4e3   :  { %799 = vadd.xlane.f32.xlu2 %v798_v55 }
 0x544   :  { %v797_v61 = vpop.xlane.xlu0 %796 }
 0x545   :  { %v801_v60 = vmul.f32 %v797_v61, %v2588_v48 }
 0x547   :  { %v803_v62 = vadd.f32 1e-05, %v801_v60  ;;  %v1924_v60 = vld [vmem:[%s2883_s2 + $0x38] sm:$0xff] }
 0x548   :  { %1004 = vmatpush.msra.mxu1 %v1924_v60 }
 0x549   :  { %2085 = vrsqrt.f32 %v803_v62  ;;  %vm811_vm6 = vweird.f32 %v803_v62 }
 0x54f   :  { %v2086_v63 = vpop.eup %2085 }
 0x550   :  { %v806_v0 = vmul.f32 %v2086_v63, %v803_v62  ;;  %vm812_vm5 = vweird.f32 %v2086_v63  ;;  %v1923_v62 = vld [vmem:[%s2883_s2 + $0x30] sm:$0xff] }
 0x551   :  { %vm813_vm7 = vmor %vm811_vm6, %vm812_vm5  ;;  %1005 = vmatpush.msra.mxu1 %v1923_v62 }
 0x552   :  { %v807_v1 = vmul.f32 %v2086_v63, %v806_v0  ;;  %v1921_v0 = vld [vmem:[%s2883_s2 + $0x20] sm:$0xff] }
 0x554   :  { %v808_v6 = vmul.f32 0.5, %v807_v1 }
 0x556   :  { %v809_v9 = vsub.f32 1.5, %v808_v6  ;;  %v800_v11 = vpop.xlane.xlu2 %799 }
 0x557   :  { %v802_v12 = vmul.f32 %v800_v11, %v2588_v48 }
 0x558   :  { %v810_v14 = vmul.f32 %v2086_v63, %v809_v9 }
 0x559   :  { %v804_v16 = vadd.f32 1e-05, %v802_v12 }
 0x55a   :  { %v814_v18 = vsel %vm813_vm7, %v2086_v63, %v810_v14  ;;  %v1922_v63 = vld [vmem:[%s2883_s2 + $0x28] sm:$0xff] }
 0x55b   :  { %v825_v19 = vmul.f32 %v814_v18, %v791_v50  ;;  %2087 = vrsqrt.f32 %v804_v16  ;;  %vm821_vm9 = vweird.f32 %v804_v16  ;;  %1006 = vmatpush.msra.mxu1 %v1922_v63 }
 0x55d   :  { %v830_v21 = vmul.f32 %v2035_v15, %v825_v19  ;;  %1007 = vmatpush.msra.mxu1 %v1921_v0 }
 0x55f   :  { %v835_v22 = vadd.f32 %v2036_v20, %v830_v21 }
 0x561   :  { %v2088_v23 = vpop.eup %2087  ;;  %1917 = vmatmul.msk.f32.vlgmr.msrb.gmra.mxu0 %vm150_vm0, %v835_v22 }
 0x562   :  { %v816_v24 = vmul.f32 %v2088_v23, %v804_v16  ;;  %vm822_vm8 = vweird.f32 %v2088_v23  ;;  %v2039_v16 = vld [vmem:[%s2893_s12] ss:$0 sm:$0xff] }
 0x563   :  { %vm823_vm10 = vmor %vm821_vm9, %vm822_vm8 }
 0x564   :  { %v817_v25 = vmul.f32 %v2088_v23, %v816_v24 }
 0x566   :  { %v818_v26 = vmul.f32 0.5, %v817_v25 }
 0x568   :  { %v819_v28 = vsub.f32 1.5, %v818_v26 }
 0x56a   :  { %v820_v29 = vmul.f32 %v2088_v23, %v819_v28 }
 0x56c   :  { %v824_v30 = vsel %vm823_vm10, %v2088_v23, %v820_v29 }
 0x56d   :  { %v826_v32 = vmul.f32 %v824_v30, %v792_v53 }
 0x56f   :  { %v831_v33 = vmul.f32 %v2035_v15, %v826_v32 }
 0x571   :  { %v836_v34 = vadd.f32 %v2036_v20, %v831_v33  ;;  %v2040_v20 = vld [vmem:[#allocation10] ss:$0 sm:$0xff] }
 0x573   :  { %1918 = vmatmul.msk.f32.gmra.mxu0 %vm150_vm0, %v836_v34 }
 0x5de   :  { %v868_v38 = vpop.f32.mrf.mxu0 }
 0x5df   :  { %v869_v39 = vadd.f32 %v2037_v37, %v868_v38 }
 0x5e1   :  { %v874_v40 = vmax.f32 %v869_v39, 0.0 }
 0x5e3   :  { %1919 = vmatmul.msk.f32.vlgmr.msrb.gmra.mxu3 %vm888_vm11, %v874_v40 }
 0x5f0   :  { %v871_v41 = vpop.f32.mrf.mxu0 }
 0x5f1   :  { %v872_v42 = vadd.f32 %v2037_v37, %v871_v41 }
 0x5f3   :  { %v875_v43 = vmax.f32 %v872_v42, 0.0 }
 0x5f5   :  { %1920 = vmatmul.msk.f32.gmra.mxu3 %vm888_vm11, %v875_v43 }
 0x666   :  { %v912_v45 = vpop.f32.mrf.mxu3 }
 0x667   :  { %v913_v46 = vadd.f32 %v2038_v44, %v912_v45 }
 0x669   :  { %v918_v47 = vadd.f32 %v913_v46, %v835_v22 }
 0x66b   :  { %v922_v4 = vsel %vm150_vm0, %v918_v47, 0.0 }
 0x66c   :  { %923 = vadd.xlane.f32.xlu2 %v922_v4 }
 0x678   :  { %v915_v49 = vpop.f32.mrf.mxu3 }
 0x679   :  { %v916_v50 = vadd.f32 %v2038_v44, %v915_v49 }
 0x67b   :  { %v919_v10 = vadd.f32 %v916_v50, %v836_v34 }
 0x67d   :  { %v925_v5 = vsel %vm150_vm0, %v919_v10, 0.0 }
 0x67e   :  { %926 = vadd.xlane.f32.xlu2 %v925_v5 }
 0x6df   :  { %v924_v51 = vpop.xlane.xlu2 %923 }
 0x6e0   :  { %v928_v52 = vmul.f32 %v924_v51, %v2588_v48 }
 0x6e2   :  { %v930_v53 = vsub.f32 %v918_v47, %v928_v52 }
 0x6e4   :  { %v932_v54 = vmul.f32 %v930_v53, %v930_v53 }
 0x6e6   :  { %v934_v55 = vsel %vm150_vm0, %v932_v54, 0.0 }
 0x6e7   :  { %935 = vadd.xlane.f32.xlu2 %v934_v55 }
 0x6f1   :  { %v927_v56 = vpop.xlane.xlu2 %926 }
 0x6f2   :  { %v929_v57 = vmul.f32 %v927_v56, %v2588_v48 }
 0x6f4   :  { %v931_v58 = vsub.f32 %v919_v10, %v929_v57 }
 0x6f6   :  { %v933_v59 = vmul.f32 %v931_v58, %v931_v58 }
 0x6f8   :  { %v937_v61 = vsel %vm150_vm0, %v933_v59, 0.0 }
 0x6f9   :  { %938 = vadd.xlane.f32.xlu2 %v937_v61 }
 0x75a   :  { %v936_v1 = vpop.xlane.xlu2 %935 }
 0x75b   :  { %v940_v2 = vmul.f32 %v936_v1, %v2588_v48 }
 0x75d   :  { %v942_v3 = vadd.f32 1e-05, %v940_v2 }
 0x75f   :  { %2089 = vrsqrt.f32 %v942_v3  ;;  %vm950_vm13 = vweird.f32 %v942_v3 }
 0x765   :  { %v2090_v6 = vpop.eup %2089 }
 0x766   :  { %v945_v7 = vmul.f32 %v2090_v6, %v942_v3  ;;  %vm951_vm12 = vweird.f32 %v2090_v6 }
 0x767   :  { %vm952_vm14 = vmor %vm950_vm13, %vm951_vm12 }
 0x768   :  { %v946_v9 = vmul.f32 %v2090_v6, %v945_v7 }
 0x76a   :  { %v947_v11 = vmul.f32 0.5, %v946_v9 }
 0x76c   :  { %v948_v12 = vsub.f32 1.5, %v947_v11  ;;  %v939_v13 = vpop.xlane.xlu2 %938 }
 0x76d   :  { %v941_v14 = vmul.f32 %v939_v13, %v2588_v48 }
 0x76e   :  { %v949_v15 = vmul.f32 %v2090_v6, %v948_v12 }
 0x76f   :  { %v943_v17 = vadd.f32 1e-05, %v941_v14 }
 0x770   :  { %v953_v18 = vsel %vm952_vm14, %v2090_v6, %v949_v15 }
 0x771   :  { %v964_v19 = vmul.f32 %v953_v18, %v930_v53  ;;  %2091 = vrsqrt.f32 %v943_v17  ;;  %vm960_vm4 = vweird.f32 %v943_v17 }
 0x773   :  { %v969_v21 = vmul.f32 %v2039_v16, %v964_v19 }
 0x775   :  { %v2668_v22 = vadd.f32 %v2040_v20, %v969_v21 }
 0x777   :  { %v2092_v23 = vpop.eup %2091  ;;  %1926 = vmatmul.msk.f32.vlgmr.msra.gmra.mxu1 %vm150_vm0, %v2668_v22 }
 0x778   :  { %v955_v24 = vmul.f32 %v2092_v23, %v943_v17  ;;  %vm961_vm15 = vweird.f32 %v2092_v23 }
 0x779   :  { %vm962_vm5 = vmor %vm960_vm4, %vm961_vm15 }
 0x77a   :  { %v956_v25 = vmul.f32 %v2092_v23, %v955_v24 }
 0x77c   :  { %v957_v26 = vmul.f32 0.5, %v956_v25 }
 0x77e   :  { %v958_v28 = vsub.f32 1.5, %v957_v26 }
 0x780   :  { %v959_v29 = vmul.f32 %v2092_v23, %v958_v28 }
 0x782   :  { %v963_v30 = vsel %vm962_vm5, %v2092_v23, %v959_v29 }
 0x783   :  { %v965_v32 = vmul.f32 %v963_v30, %v931_v58 }
 0x785   :  { %v970_v33 = vmul.f32 %v2039_v16, %v965_v32 }
 0x787   :  { %v2672_v34 = vadd.f32 %v2040_v20, %v970_v33 }
 0x789   :  { %1927 = vmatmul.msk.f32.gmra.mxu1 %vm150_vm0, %v2672_v34 }
 0x7f4   :  { %v1009_v8 = vpop.f32.mrf.mxu1 }
 0x7f5   :  { %v1010_v36 = vadd.f32 %v2041_v35, %v1009_v8 }
 0x7f7   :  { %1018 = vrot.lane.b32.xlu1 %v1010_v36, %s2299_s18  ;;  %v1015_v41 = vmul.f32 0.35355338, %v1010_v36 }
 0x7ff   :  { %1149 = vrot.lane.b32.xlu1 %v1010_v36, %s2298_s0 }
 0x806   :  { %v1012_v37 = vpop.f32.mrf.mxu1 }
 0x807   :  { %v1013_v38 = vadd.f32 %v2041_v35, %v1012_v37 }
 0x809   :  { %1177 = vrot.lane.b32.xlu2 %v1013_v38, %s2298_s0  ;;  %1046 = vrot.lane.b32.xlu0 %v1013_v38, %s2299_s18  ;;  %v1016_v39 = vmul.f32 0.35355338, %v1013_v38  ;;  %v2683_v40 = vpack.i.bf16 %v1013_v38, %v1010_v36  ;;  %s2907_s0 = smov 8   ;;  %s2908_s18 = smov 16  }
 0x80b   :  { %1305 = vrot.lane.b32.xlu1 %v1016_v39, %s2303_s17 }
 0x811   :  { %1147 = vrot.lane.b32.xlu2 %v1015_v41, %s2301_s28  ;;  %1175 = vrot.lane.b32.xlu0 %v1016_v39, %s2301_s28 }
 0x813   :  { %1437 = vrot.lane.b32.xlu1 %v1013_v38, %s2302_s5 }
 0x819   :  { %1279 = vrot.lane.b32.xlu2 %v1010_v36, %s2300_s1  ;;  %1307 = vrot.lane.b32.xlu0 %v1013_v38, %s2300_s1 }
 0x81b   :  { %1407 = vrot.lane.b32.xlu1 %v1015_v41, %s2304_s13 }
 0x821   :  { %1435 = vrot.lane.b32.xlu2 %v1016_v39, %s2304_s13  ;;  %1277 = vrot.lane.b32.xlu0 %v1015_v41, %s2303_s17 }
 0x829   :  { %1409 = vrot.lane.b32.xlu0 %v1010_v36, %s2302_s5 }
 0x863   :  { %v1178_v42 = vpop.permute.xlu2 %1177 }
 0x864   :  { %1936 = vmatpush.xpose.msk.msra.mxu3 %vm185_vm1, %v1178_v42 }
 0x869   :  { %v1019_v43 = vpop.permute.xlu1 %1018 }
 0x86a   :  { %1928 = vmatpush.xpose.msk.msra.mxu2 %vm185_vm1, %v1019_v43 }
 0x86b   :  { %v1148_v44 = vpop.permute.xlu2 %1147 }
 0x86d   :  { %1929 = vmatmul.msk.f32.vlgmr.msra.gmra.mxu2 %vm185_vm1, %v1015_v41 }
 0x871   :  { %v1150_v45 = vpop.permute.xlu1 %1149 }
 0x873   :  { %v1280_v47 = vpop.permute.xlu2 %1279 }
 0x87b   :  { %v1047_v46 = vpop.permute.xlu0 %1046  ;;  %v1436_v51 = vpop.permute.xlu2 %1435 }
 0x87c   :  { %1930 = vmatpush.xpose.msk.msra.mxu0 %vm185_vm1, %v1047_v46 }
 0x87d   :  { %v1306_v4 = vpop.permute.xlu1 %1305 }
 0x87f   :  { %1931 = vmatmul.msk.f32.vlgmr.msra.gmra.mxu0 %vm185_vm1, %v1016_v39 }
 0x880   :  { %1934 = vmatpush.xpose.msk.msrb.mxu0 %vm185_vm1, %v1150_v45 }
 0x883   :  { %v1176_v49 = vpop.permute.xlu0 %1175 }
 0x884   :  { %1940 = vmatpush.xpose.msk.msra.mxu0 %vm185_vm1, %v1280_v47  ;;  %1937 = vmatmul.msk.f32.vlgmr.msra.gmra.mxu3 %vm185_vm1, %v1176_v49 }
 0x885   :  { %v1438_v10 = vpop.permute.xlu1 %1437 }
 0x887   :  { %1935 = vmatmul.msk.f32.vlgmr.msrb.gmra.mxu0 %vm185_vm1, %v1148_v44 }
 0x88b   :  { %v1308_v50 = vpop.permute.xlu0 %1307 }
 0x88c   :  { %1942 = vmatpush.xpose.msk.msrb.mxu3 %vm185_vm1, %v1308_v50 }
 0x88d   :  { %v1408_v53 = vpop.permute.xlu1 %1407 }
 0x88f   :  { %1943 = vmatmul.msk.f32.vlgmr.msrb.gmra.mxu3 %vm185_vm1, %v1306_v4 }
 0x890   :  { %1948 = vmatpush.xpose.msk.msra.mxu3 %vm185_vm1, %v1438_v10 }
 0x893   :  { %v1278_v5 = vpop.permute.xlu0 %1277 }
 0x894   :  { %1941 = vmatmul.msk.f32.vlgmr.msra.gmra.mxu0 %vm185_vm1, %v1278_v5 }
 0x897   :  { %1949 = vmatmul.msk.f32.vlgmr.msra.gmra.mxu3 %vm185_vm1, %v1436_v51 }
 0x89b   :  { %v1410_v52 = vpop.permute.xlu0 %1409 }
 0x89c   :  { %1946 = vmatpush.xpose.msk.msrb.mxu0 %vm185_vm1, %v1410_v52 }
 0x89f   :  { %1947 = vmatmul.msk.f32.vlgmr.msrb.gmra.mxu0 %vm185_vm1, %v1408_v53 }
 0x8f0   :  { %v1042_v54 = vpop.f32.mrf.mxu2 }
 0x8f1   :  { %v1043_v55 = vadd.f32 %v2494_v27, %v1042_v54 }
 0x8f3   :  { %v1073_v56 = vsel %vm185_vm1, %v1043_v55, -inf }
 0x8f4   :  { %1074 = vmax.xlane.f32.xlu2 %v1073_v56 }
 0x8fc   :  { %v1070_v57 = vpop.f32.mrf.mxu0 }
 0x8fd   :  { %v1071_v58 = vadd.f32 %v2498_v31, %v1070_v57 }
 0x8ff   :  { %v1076_v59 = vsel %vm185_vm1, %v1071_v58, -inf }
 0x900   :  { %1077 = vmax.xlane.f32.xlu0 %v1076_v59 }
 0x904   :  { %v1172_v61 = vpop.f32.mrf.mxu0 }
 0x905   :  { %v1173_v60 = vadd.f32 %v2494_v27, %v1172_v61 }
 0x907   :  { %v1200_v62 = vpop.f32.mrf.mxu3  ;;  %v1203_v63 = vsel %vm185_vm1, %v1173_v60, -inf }
 0x908   :  { %v1201_v0 = vadd.f32 %v2498_v31, %v1200_v62  ;;  %1204 = vmax.xlane.f32.xlu1 %v1203_v63 }
 0x90a   :  { %v1206_v1 = vsel %vm185_vm1, %v1201_v0, -inf }
 0x90b   :  { %1207 = vmax.xlane.f32.xlu2 %v1206_v1 }
 0x911   :  { %v1302_v2 = vpop.f32.mrf.mxu0 }
 0x912   :  { %v1303_v3 = vadd.f32 %v2494_v27, %v1302_v2  ;;  %v1330_v6 = vpop.f32.mrf.mxu3 }
 0x913   :  { %v1331_v7 = vadd.f32 %v2498_v31, %v1330_v6 }
 0x914   :  { %v1333_v9 = vsel %vm185_vm1, %v1303_v3, -inf }
 0x915   :  { %1334 = vmax.xlane.f32.xlu0 %v1333_v9  ;;  %v1336_v11 = vsel %vm185_vm1, %v1331_v7, -inf }
 0x916   :  { %1337 = vmax.xlane.f32.xlu1 %v1336_v11 }
 0x91a   :  { %v1460_v12 = vpop.f32.mrf.mxu3 }
 0x91b   :  { %v1461_v13 = vadd.f32 %v2498_v31, %v1460_v12 }
 0x91c   :  { %v1432_v14 = vpop.f32.mrf.mxu0 }
 0x91d   :  { %v1433_v15 = vadd.f32 %v2494_v27, %v1432_v14  ;;  %v1466_v16 = vsel %vm185_vm1, %v1461_v13, -inf }
 0x91e   :  { %1467 = vmax.xlane.f32.xlu0 %v1466_v16 }
 0x91f   :  { %v1463_v17 = vsel %vm185_vm1, %v1433_v15, -inf }
 0x920   :  { %1464 = vmax.xlane.f32.xlu2 %v1463_v17 }
 0x92f   :  { %2012 = vrot.lane.b32.xlu1 %v2683_v40, %s2306_s20 }
 0x967   :  { %v1075_v18 = vpop.xlane.xlu2 %1074 }
 0x968   :  { %v1079_v19 = vsub.f32 %v1043_v55, %v1075_v18 }
 0x96a   :  { %v1081_v20 = vmul.f32 1.442695, %v1079_v19 }
 0x96c   :  { %2093 = vpow2.f32 %v1081_v20 }
 0x972   :  { %v2729_v21 = vpop.eup %2093 }
 0x973   :  { %v1078_v23 = vpop.xlane.xlu0 %1077  ;;  %v1085_v31 = vsel %vm185_vm1, %v2729_v21, 0.0 }
 0x974   :  { %v1080_v27 = vsub.f32 %v1071_v58, %v1078_v23  ;;  %1086 = vadd.xlane.f32.xlu1 %v1085_v31 }
 0x976   :  { %v1083_v24 = vmul.f32 1.442695, %v1080_v27 }
 0x978   :  { %2095 = vpow2.f32 %v1083_v24 }
 0x97b   :  { %v1205_v25 = vpop.xlane.xlu1 %1204 }
 0x97c   :  { %v1209_v26 = vsub.f32 %v1173_v60, %v1205_v25 }
 0x97e   :  { %v2096_v28 = vpop.eup %2095  ;;  %v1211_v29 = vmul.f32 1.442695, %v1209_v26  ;;  %v1208_v30 = vpop.xlane.xlu2 %1207 }
 0x97f   :  { %v1210_v32 = vsub.f32 %v1201_v0, %v1208_v30  ;;  %v1088_v33 = vsel %vm185_vm1, %v2096_v28, 0.0 }
 0x980   :  { %2097 = vpow2.f32 %v1211_v29  ;;  %1089 = vadd.xlane.f32.xlu2 %v1088_v33 }
 0x981   :  { %v1213_v35 = vmul.f32 1.442695, %v1210_v32 }
 0x983   :  { %2099 = vpow2.f32 %v1213_v35 }
 0x986   :  { %v2734_v8 = vpop.eup %2097 }
 0x987   :  { %v1215_v36 = vsel %vm185_vm1, %v2734_v8, 0.0 }
 0x988   :  { %1216 = vadd.xlane.f32.xlu0 %v1215_v36  ;;  %v1335_v38 = vpop.xlane.xlu0 %1334 }
 0x989   :  { %v2100_v37 = vpop.eup %2099  ;;  %v1338_v39 = vpop.xlane.xlu1 %1337  ;;  %v1339_v43 = vsub.f32 %v1303_v3, %v1335_v38 }
 0x98a   :  { %v1340_v41 = vsub.f32 %v1331_v7, %v1338_v39  ;;  %v1218_v42 = vsel %vm185_vm1, %v2100_v37, 0.0 }
 0x98b   :  { %1219 = vadd.xlane.f32.xlu2 %v1218_v42  ;;  %v1341_v45 = vmul.f32 1.442695, %v1339_v43  ;;  %v1955_v43 = vld [vmem:[%s2885_s4 + $0x38] sm:$0xff] }
 0x98c   :  { %v1343_v44 = vmul.f32 1.442695, %v1340_v41  ;;  %1595 = vmatpush.msra.mxu0 %v1955_v43 }
 0x98d   :  { %2022 = vrot.lane.b32.xlu1 %v2683_v40, %s2307_s11 }
 0x98e   :  { %2101 = vpow2.f32 %v1343_v44  ;;  %v1954_v44 = vld [vmem:[%s2885_s4 + $0x30] sm:$0xff] }
 0x98f   :  { %2103 = vpow2.f32 %v1341_v45  ;;  %v1953_v45 = vld [vmem:[%s2885_s4 + $0x28] sm:$0xff]  ;;  %1596 = vmatpush.msra.mxu0 %v1954_v44 }
 0x991   :  { %v1468_v10 = vpop.xlane.xlu0 %1467  ;;  %1597 = vmatpush.msra.mxu0 %v1953_v45 }
 0x992   :  { %v1470_v51 = vsub.f32 %v1461_v13, %v1468_v10 }
 0x993   :  { %v1465_v46 = vpop.xlane.xlu2 %1464 }
 0x994   :  { %v2741_v47 = vpop.eup %2101  ;;  %v1469_v4 = vsub.f32 %v1433_v15, %v1465_v46  ;;  %v1473_v53 = vmul.f32 1.442695, %v1470_v51  ;;  %v1952_v46 = vld [vmem:[%s2885_s4 + $0x20] sm:$0xff] }
 0x995   :  { %2027 = vrot.lane.b32.xlu1 %v2683_v40, %s2308_s21  ;;  %v1348_v49 = vsel %vm185_vm1, %v2741_v47, 0.0  ;;  %v2104_v5 = vpop.eup %2103  ;;  %1598 = vmatpush.msra.mxu0 %v1952_v46 }
 0x996   :  { %1349 = vadd.xlane.f32.xlu0 %v1348_v49  ;;  %v1471_v50 = vmul.f32 1.442695, %v1469_v4  ;;  %v1345_v52 = vsel %vm185_vm1, %v2104_v5, 0.0 }
 0x998   :  { %2105 = vpow2.f32 %v1471_v50 }
 0x999   :  { %2107 = vpow2.f32 %v1473_v53 }
 0x99e   :  { %1346 = vadd.xlane.f32.xlu0 %v1345_v52  ;;  %v2106_v55 = vpop.eup %2105 }
 0x99f   :  { %v1475_v58 = vsel %vm185_vm1, %v2106_v55, 0.0  ;;  %v2108_v59 = vpop.eup %2107 }
 0x9a0   :  { %v1478_v61 = vsel %vm185_vm1, %v2108_v59, 0.0 }
 0x9a1   :  { %v2013_v54 = vpop.permute.xlu1 %2012 }
 0x9a2   :  { %v2015_v56 = vunpack.i.h.bf16 %v2013_v54  ;;  %v2014_v57 = vunpack.i.l.bf16 %v2013_v54 }
 0x9a3   :  { %2017 = vrot.lane.b32.xlu2 %v2683_v40, %s2906_s3 }
 0x9a4   :  { %1116 = vmatpush.msrb.mxu1 %v2014_v57  ;;  %1142 = vmatpush.msrb.mxu2 %v2015_v56  ;;  %v2042_v57 = vld [vmem:[#allocation7 + $0x1] ss:$0 sm:$0xff] }
 0x9a6   :  { %1476 = vadd.xlane.f32.xlu0 %v1475_v58 }
 0x9ae   :  { %1479 = vadd.xlane.f32.xlu0 %v1478_v61 }
 0x9e7   :  { %v1087_v60 = vpop.xlane.xlu1 %1086 }
 0x9e8   :  { %2109 = vrcp.f32 %v1087_v60 }
 0x9ee   :  { %v2110_v62 = vpop.eup %2109 }
 0x9ef   :  { %v1093_v63 = vmul.f32 %v2110_v62, %v2729_v21 }
 0x9f1   :  { %1932 = vmatmul.msk.f32.vlgmr.msrb.gmra.mxu1 %vm185_vm1, %v1093_v63 }
 0x9f3   :  { %v1090_v0 = vpop.xlane.xlu2 %1089 }
 0x9f4   :  { %2111 = vrcp.f32 %v1090_v0 }
 0x9fa   :  { %v2112_v40 = vpop.eup %2111 }
 0x9fb   :  { %v1094_v1 = vmul.f32 %v2112_v40, %v2096_v28  ;;  %v1217_v2 = vpop.xlane.xlu0 %1216 }
 0x9fc   :  { %2113 = vrcp.f32 %v1217_v2 }
 0x9fd   :  { %1933 = vmatmul.msk.f32.vlgmr.msrb.gmra.mxu2 %vm185_vm1, %v1094_v1 }
 0x9fe   :  { %v1220_v3 = vpop.xlane.xlu2 %1219 }
 0x9ff   :  { %2115 = vrcp.f32 %v1220_v3  ;;  %v2023_v6 = vpop.permute.xlu1 %2022 }
 0xa00   :  { %v2025_v19 = vunpack.i.h.bf16 %v2023_v6  ;;  %v2024_v20 = vunpack.i.l.bf16 %v2023_v6 }
 0xa02   :  { %v2114_v7 = vpop.eup %2113 }
 0xa03   :  { %v1223_v15 = vmul.f32 %v2114_v7, %v2734_v8 }
 0xa05   :  { %v2116_v9 = vpop.eup %2115 }
 0xa06   :  { %v2018_v11 = vpop.permute.xlu2 %2017  ;;  %v1224_v16 = vmul.f32 %v2116_v9, %v2100_v37 }
 0xa07   :  { %v2020_v12 = vunpack.i.h.bf16 %v2018_v11  ;;  %v2019_v13 = vunpack.i.l.bf16 %v2018_v11  ;;  %v2028_v14 = vpop.permute.xlu1 %2027 }
 0xa08   :  { %v2030_v17 = vunpack.i.h.bf16 %v2028_v14  ;;  %v2029_v18 = vunpack.i.l.bf16 %v2028_v14  ;;  %v1961_v14 = vld [vmem:[%s2887_s6 + $0x30] sm:$0xff] }
 0xa09   :  { %1246 = vmatpush.msra.mxu1 %v2019_v13  ;;  %1272 = vmatpush.msra.mxu2 %v2020_v12  ;;  %v1350_v21 = vpop.xlane.xlu0 %1349 }
 0xa0a   :  { %2117 = vrcp.f32 %v1350_v21  ;;  %1938 = vmatmul.msk.f32.vlgmr.msra.gmra.mxu1 %vm185_vm1, %v1223_v15  ;;  %1939 = vmatmul.msk.f32.vlgmr.msra.gmra.mxu2 %vm185_vm1, %v1224_v16  ;;  %v1960_v15 = vld [vmem:[%s2887_s6 + $0x28] sm:$0xff]  ;;  %v1959_v16 = vld [vmem:[%s2887_s6 + $0x20] sm:$0xff]  ;;  %v1972_v21 = vld [vmem:[%s2889_s8 + $0x70] sm:$0xff] }
 0xa0b   :  { %1376 = vmatpush.msrb.mxu1 %v2024_v20  ;;  %1402 = vmatpush.msrb.mxu2 %v2025_v19  ;;  %v1973_v20 = vld [vmem:[%s2889_s8 + $0x78] sm:$0xff] }
 0xa0d   :  { %1506 = vmatpush.msra.mxu1 %v2029_v18  ;;  %1532 = vmatpush.msra.mxu2 %v2030_v17 }
 0xa10   :  { %v2118_v23 = vpop.eup %2117 }
 0xa11   :  { %v1354_v31 = vmul.f32 %v2118_v23, %v2741_v47  ;;  %v1347_v27 = vpop.xlane.xlu0 %1346  ;;  %v1971_v23 = vld [vmem:[%s2889_s8 + $0x68] sm:$0xff] }
 0xa12   :  { %2119 = vrcp.f32 %v1347_v27 }
 0xa13   :  { %1945 = vmatmul.msk.f32.vlgmr.msrb.gmra.mxu2 %vm185_vm1, %v1354_v31 }
 0xa18   :  { %v2120_v24 = vpop.eup %2119 }
 0xa19   :  { %v1353_v25 = vmul.f32 %v2120_v24, %v2104_v5  ;;  %v1477_v26 = vpop.xlane.xlu0 %1476  ;;  %v1970_v24 = vld [vmem:[%s2889_s8 + $0x60] sm:$0xff] }
 0xa1a   :  { %2121 = vrcp.f32 %v1477_v26 }
 0xa1b   :  { %1944 = vmatmul.msk.f32.vlgmr.msrb.gmra.mxu1 %vm185_vm1, %v1353_v25 }
 0xa1c   :  { %1735 = vmatpush.msrb.mxu1 %v1973_v20 }
 0xa1e   :  { %1736 = vmatpush.msrb.mxu1 %v1972_v21 }
 0xa20   :  { %v2122_v28 = vpop.eup %2121  ;;  %1737 = vmatpush.msrb.mxu1 %v1971_v23 }
 0xa21   :  { %v1483_v29 = vmul.f32 %v2122_v28, %v2106_v55  ;;  %v1480_v30 = vpop.xlane.xlu0 %1479 }
 0xa22   :  { %2123 = vrcp.f32 %v1480_v30  ;;  %1738 = vmatpush.msrb.mxu1 %v1970_v24 }
 0xa23   :  { %1950 = vmatmul.msk.f32.vlgmr.msra.gmra.mxu1 %vm185_vm1, %v1483_v29  ;;  %v1969_v29 = vld [vmem:[%s2889_s8 + $0x58] sm:$0xff] }
 0xa24   :  { %1739 = vmatpush.msrb.mxu1 %v1969_v29 }
 0xa28   :  { %v2124_v32 = vpop.eup %2123 }
 0xa29   :  { %v1484_v33 = vmul.f32 %v2124_v32, %v2108_v59 }
 0xa2b   :  { %1951 = vmatmul.msk.f32.vlgmr.msra.gmra.mxu2 %vm185_vm1, %v1484_v33 }
 0xa6e   :  { %v1118_v35 = vpop.f32.mrf.mxu1 }
 0xa80   :  { %v1144_v8 = vpop.f32.mrf.mxu2 }
 0xa87   :  { %v1248_v36 = vpop.f32.mrf.mxu1 }
 0xa88   :  { %1539 = vrot.lane.b32.xlu2 %v1248_v36, %s2907_s0  ;;  %v2043_v36 = vld [vmem:[%s2891_s10 + $0x1] ss:$0 sm:$0xff] }
 0xa8d   :  { %v1274_v37 = vpop.f32.mrf.mxu2 }
 0xa90   :  { %1541 = vrot.lane.b32.xlu2 %v1274_v37, %s2907_s0 }
 0xa96   :  { %v1404_v41 = vpop.f32.mrf.mxu2 }
 0xa98   :  { %v1378_v38 = vpop.f32.mrf.mxu1 }
 0xa99   :  { %1547 = vrot.lane.b32.xlu0 %v1378_v38, %s2908_s18 }
 0xaa0   :  { %v1508_v39 = vpop.f32.mrf.mxu1 }
 0xaa1   :  { %1555 = vrot.lane.b32.xlu1 %v1508_v39, %s2309_s22 }
 0xaa9   :  { %1549 = vrot.lane.b32.xlu1 %v1404_v41, %s2908_s18  ;;  %s1874_s18 = sshll.u32 %s2897_s16, 4  ;;  %s1875_s18 = int_to_ptr.hbm [resolvable:$true] %s1874_s18 }
 0xaae   :  { %v1534_v42 = vpop.f32.mrf.mxu2 }
 0xaaf   :  { %1557 = vrot.lane.b32.xlu2 %v1534_v42, %s2309_s22  ;;  %v2044_v42 = vld [vmem:[#allocation8 + $0x1] ss:$0 sm:$0xff] }
 0xae2   :  { %v1540_v47 = vpop.permute.xlu2 %1539 }
 0xae3   :  { %v1561_v49 = vsel %vm185_vm1, %v1118_v35, %v1540_v47 }
 0xaea   :  { %v1542_v5 = vpop.permute.xlu2 %1541 }
 0xaeb   :  { %v1562_v52 = vsel %vm185_vm1, %v1144_v8, %v1542_v5  ;;  %v1968_v5 = vld [vmem:[%s2889_s8 + $0x50] sm:$0xff] }
 0xaec   :  { %1740 = vmatpush.msrb.mxu1 %v1968_v5 }
 0xb09   :  { %v1558_v54 = vpop.permute.xlu2 %1557 }
 0xb0b   :  { %v1548_v4 = vpop.permute.xlu0 %1547 }
 0xb0c   :  { %v1563_v50 = vsel %vm729_vm2, %v1561_v49, %v1548_v4 }
 0xb13   :  { %v1556_v10 = vpop.permute.xlu1 %1555 }
 0xb14   :  { %v1565_v51 = vsel %vm732_vm3, %v1563_v50, %v1556_v10 }
 0xb15   :  { %1956 = vmatmul.msk.f32.vlgmr.msra.gmra.mxu0 %vm150_vm0, %v1565_v51  ;;  %v1967_v51 = vld [vmem:[%s2889_s8 + $0x48] sm:$0xff] }
 0xb16   :  { %1741 = vmatpush.msrb.mxu1 %v1967_v51 }
 0xb1b   :  { %v1550_v53 = vpop.permute.xlu1 %1549 }
 0xb1c   :  { %v1564_v55 = vsel %vm729_vm2, %v1562_v52, %v1550_v53  ;;  %v1966_v52 = vld [vmem:[%s2889_s8 + $0x40] sm:$0xff] }
 0xb1d   :  { %v1566_v56 = vsel %vm732_vm3, %v1564_v55, %v1558_v54  ;;  %1742 = vmatpush.msrb.mxu1 %v1966_v52  ;;  %v2045_v53 = vld [vmem:[%s2888_s7 + $0x1] ss:$0 sm:$0xff] }
 0xb1e   :  { %1957 = vmatmul.msk.f32.gmra.mxu0 %vm150_vm0, %v1566_v56 }
 0xb92   :  { %v1600_v58 = vpop.f32.mrf.mxu0 }
 0xb93   :  { %v1601_v59 = vadd.f32 %v2042_v57, %v1600_v58 }
 0xb95   :  { %v1606_v61 = vadd.f32 %v1601_v59, %v2668_v22 }
 0xb97   :  { %v1612_v60 = vsel %vm150_vm0, %v1606_v61, 0.0 }
 0xb98   :  { %1613 = vadd.xlane.f32.xlu1 %v1612_v60 }
 0xb9b   :  { %v1603_v62 = vpop.f32.mrf.mxu0 }
 0xb9c   :  { %v1604_v63 = vadd.f32 %v2042_v57, %v1603_v62 }
 0xb9e   :  { %v1607_v0 = vadd.f32 %v1604_v63, %v2672_v34  ;;  %v1962_v34 = vld [vmem:[%s2887_s6 + $0x38] sm:$0xff] }
 0xb9f   :  { %1694 = vmatpush.msrb.mxu3 %v1962_v34 }
 0xba0   :  { %v1615_v40 = vsel %vm150_vm0, %v1607_v0, 0.0 }
 0xba1   :  { %1616 = vadd.xlane.f32.xlu0 %v1615_v40  ;;  %1695 = vmatpush.msrb.mxu3 %v1961_v14 }
 0xba3   :  { %1696 = vmatpush.msrb.mxu3 %v1960_v15 }
 0xba5   :  { %1697 = vmatpush.msrb.mxu3 %v1959_v16 }
 0xc0b   :  { %v1614_v1 = vpop.xlane.xlu1 %1613 }
 0xc0c   :  { %v1618_v2 = vmul.f32 %v1614_v1, %v2588_v48 }
 0xc0e   :  { %v1620_v3 = vsub.f32 %v1606_v61, %v1618_v2  ;;  %v2046_v61 = vld [vmem:[%s2890_s9 + $0x1] ss:$0 sm:$0xff] }
 0xc10   :  { %v1622_v6 = vmul.f32 %v1620_v3, %v1620_v3 }
 0xc12   :  { %v1624_v7 = vsel %vm150_vm0, %v1622_v6, 0.0 }
 0xc13   :  { %1625 = vadd.xlane.f32.xlu2 %v1624_v7 }
 0xc14   :  { %v1617_v9 = vpop.xlane.xlu0 %1616 }
 0xc15   :  { %v1619_v22 = vmul.f32 %v1617_v9, %v2588_v48 }
 0xc17   :  { %v1621_v11 = vsub.f32 %v1607_v0, %v1619_v22 }
 0xc19   :  { %v1623_v12 = vmul.f32 %v1621_v11, %v1621_v11 }
 0xc1b   :  { %v1627_v13 = vsel %vm150_vm0, %v1623_v12, 0.0 }
 0xc1c   :  { %1628 = vadd.xlane.f32.xlu1 %v1627_v13 }
 0xc86   :  { %v1626_v17 = vpop.xlane.xlu2 %1625 }
 0xc87   :  { %v1630_v18 = vmul.f32 %v1626_v17, %v2588_v48 }
 0xc89   :  { %v1632_v19 = vadd.f32 1e-05, %v1630_v18 }
 0xc8b   :  { %2125 = vrsqrt.f32 %v1632_v19  ;;  %vm1640_vm2 = vweird.f32 %v1632_v19 }
 0xc8f   :  { %v1629_v31 = vpop.xlane.xlu1 %1628 }
 0xc90   :  { %v1631_v27 = vmul.f32 %v1629_v31, %v2588_v48 }
 0xc91   :  { %v2126_v25 = vpop.eup %2125 }
 0xc92   :  { %v1635_v26 = vmul.f32 %v2126_v25, %v1632_v19  ;;  %v1633_v28 = vadd.f32 1e-05, %v1631_v27  ;;  %vm1641_vm1 = vweird.f32 %v2126_v25 }
 0xc93   :  { %vm1642_vm3 = vmor %vm1640_vm2, %vm1641_vm1 }
 0xc94   :  { %v1636_v30 = vmul.f32 %v2126_v25, %v1635_v26  ;;  %2127 = vrsqrt.f32 %v1633_v28  ;;  %vm1650_vm7 = vweird.f32 %v1633_v28 }
 0xc96   :  { %v1637_v32 = vmul.f32 0.5, %v1636_v30  ;;  %v2047_v30 = vld [vmem:[%s2893_s12 + $0x1] ss:$0 sm:$0xff] }
 0xc98   :  { %v1638_v33 = vsub.f32 1.5, %v1637_v32 }
 0xc9a   :  { %v2128_v35 = vpop.eup %2127  ;;  %v1639_v8 = vmul.f32 %v2126_v25, %v1638_v33 }
 0xc9b   :  { %v1645_v37 = vmul.f32 %v2128_v35, %v1633_v28  ;;  %vm1651_vm6 = vweird.f32 %v2128_v35 }
 0xc9c   :  { %v1643_v38 = vsel %vm1642_vm3, %v2126_v25, %v1639_v8  ;;  %vm1652_vm8 = vmor %vm1650_vm7, %vm1651_vm6  ;;  %v2048_v8 = vld [vmem:[#allocation10 + $0x1] ss:$0 sm:$0xff] }
 0xc9d   :  { %v1654_v39 = vmul.f32 %v1643_v38, %v1620_v3  ;;  %v1646_v41 = vmul.f32 %v2128_v35, %v1645_v37 }
 0xc9f   :  { %v1659_v43 = vmul.f32 %v2043_v36, %v1654_v39  ;;  %v1647_v44 = vmul.f32 0.5, %v1646_v41 }
 0xca1   :  { %v1648_v45 = vsub.f32 1.5, %v1647_v44  ;;  %v1664_v46 = vadd.f32 %v2044_v42, %v1659_v43 }
 0xca3   :  { %v1649_v47 = vmul.f32 %v2128_v35, %v1648_v45  ;;  %1964 = vmatmul.msk.f32.vlgmr.msrb.gmra.mxu3 %vm150_vm0, %v1664_v46 }
 0xca5   :  { %v1653_v4 = vsel %vm1652_vm8, %v2128_v35, %v1649_v47 }
 0xca6   :  { %v1655_v49 = vmul.f32 %v1653_v4, %v1621_v11 }
 0xca8   :  { %v1660_v50 = vmul.f32 %v2043_v36, %v1655_v49 }
 0xcaa   :  { %v1665_v10 = vadd.f32 %v2044_v42, %v1660_v50 }
 0xcac   :  { %1965 = vmatmul.msk.f32.gmra.mxu3 %vm150_vm0, %v1665_v10 }
 0xd26   :  { %v1699_v54 = vpop.f32.mrf.mxu3 }
 0xd27   :  { %v1700_v55 = vadd.f32 %v2045_v53, %v1699_v54 }
 0xd29   :  { %v1705_v56 = vmax.f32 %v1700_v55, 0.0 }
 0xd2b   :  { %1975 = vmatmul.msk.f32.vlgmr.msrb.gmra.mxu1 %vm888_vm11, %v1705_v56 }
 0xd2f   :  { %v1702_v57 = vpop.f32.mrf.mxu3 }
 0xd30   :  { %v1703_v58 = vadd.f32 %v2045_v53, %v1702_v57 }
 0xd32   :  { %v1706_v59 = vmax.f32 %v1703_v58, 0.0 }
 0xd34   :  { %1976 = vmatmul.msk.f32.gmra.mxu1 %vm888_vm11, %v1706_v59 }
 0xda8   :  { %v1744_v60 = vpop.f32.mrf.mxu1 }
 0xda9   :  { %v1745_v62 = vadd.f32 %v2046_v61, %v1744_v60 }
 0xdab   :  { %v1750_v63 = vadd.f32 %v1745_v62, %v1664_v46 }
 0xdad   :  { %v1756_v0 = vsel %vm150_vm0, %v1750_v63, 0.0 }
 0xdae   :  { %1757 = vadd.xlane.f32.xlu0 %v1756_v0 }
 0xdb1   :  { %v1747_v40 = vpop.f32.mrf.mxu1 }
 0xdb2   :  { %v1748_v1 = vadd.f32 %v2046_v61, %v1747_v40 }
 0xdb4   :  { %v1751_v2 = vadd.f32 %v1748_v1, %v1665_v10 }
 0xdb6   :  { %v1759_v3 = vsel %vm150_vm0, %v1751_v2, 0.0 }
 0xdb7   :  { %1760 = vadd.xlane.f32.xlu2 %v1759_v3 }
 0xe21   :  { %v1758_v6 = vpop.xlane.xlu0 %1757 }
 0xe22   :  { %v1762_v7 = vmul.f32 %v1758_v6, %v2588_v48  ;;  %v2049_v6 = vld [vmem:[%s2895_s14] ss:$0 sm:$0xff]  ;;  %s2311_s14 = smov [#allocation11]  }
 0xe23   :  { %s1872_s2 = sshll.u32 %s2311_s14, 4  ;;  %s1873_s2 = int_to_ptr.vmem [resolvable:$true] %s1872_s2 }
 0xe24   :  { %v1764_v9 = vsub.f32 %v1750_v63, %v1762_v7 }
 0xe26   :  { %v1766_v22 = vmul.f32 %v1764_v9, %v1764_v9 }
 0xe28   :  { %v1768_v11 = vsel %vm150_vm0, %v1766_v22, 0.0 }
 0xe29   :  { %1769 = vadd.xlane.f32.xlu1 %v1768_v11  ;;  %v2050_v11 = vld [vmem:[%s2896_s15] ss:$0 sm:$0xff]  ;;  %s2909_s15 = smov 128  }
 0xe2a   :  { %v1761_v12 = vpop.xlane.xlu2 %1760 }
 0xe2b   :  { %v1763_v13 = vmul.f32 %v1761_v12, %v2588_v48 }
 0xe2d   :  { %v1765_v34 = vsub.f32 %v1751_v2, %v1763_v13 }
 0xe2f   :  { %v1767_v14 = vmul.f32 %v1765_v34, %v1765_v34 }
 0xe31   :  { %v1771_v15 = vsel %vm150_vm0, %v1767_v14, 0.0 }
 0xe32   :  { %1772 = vadd.xlane.f32.xlu0 %v1771_v15 }
 0xe9c   :  { %v1770_v16 = vpop.xlane.xlu1 %1769 }
 0xe9d   :  { %v1774_v17 = vmul.f32 %v1770_v16, %v2588_v48 }
 0xe9f   :  { %v1776_v18 = vadd.f32 1e-05, %v1774_v17 }
 0xea1   :  { %2129 = vrsqrt.f32 %v1776_v18  ;;  %vm1784_vm10 = vweird.f32 %v1776_v18 }
 0xea5   :  { %v1773_v19 = vpop.xlane.xlu0 %1772 }
 0xea6   :  { %v1775_v20 = vmul.f32 %v1773_v19, %v2588_v48 }
 0xea7   :  { %v2130_v21 = vpop.eup %2129 }
 0xea8   :  { %v1779_v23 = vmul.f32 %v2130_v21, %v1776_v18  ;;  %v1777_v31 = vadd.f32 1e-05, %v1775_v20  ;;  %vm1785_vm9 = vweird.f32 %v2130_v21 }
 0xea9   :  { %vm1786_vm11 = vmor %vm1784_vm10, %vm1785_vm9 }
 0xeaa   :  { %v1780_v27 = vmul.f32 %v2130_v21, %v1779_v23  ;;  %2131 = vrsqrt.f32 %v1777_v31  ;;  %vm1794_vm13 = vweird.f32 %v1777_v31 }
 0xeac   :  { %v1781_v24 = vmul.f32 0.5, %v1780_v27 }
 0xeae   :  { %v1782_v25 = vsub.f32 1.5, %v1781_v24 }
 0xeb0   :  { %v2132_v26 = vpop.eup %2131  ;;  %v1783_v28 = vmul.f32 %v2130_v21, %v1782_v25 }
 0xeb1   :  { %v1789_v29 = vmul.f32 %v2132_v26, %v1777_v31  ;;  %vm1795_vm12 = vweird.f32 %v2132_v26 }
 0xeb2   :  { %v1787_v32 = vsel %vm1786_vm11, %v2130_v21, %v1783_v28  ;;  %vm1796_vm14 = vmor %vm1794_vm13, %vm1795_vm12 }
 0xeb3   :  { %v1790_v33 = vmul.f32 %v2132_v26, %v1789_v29  ;;  %v1798_v35 = vmul.f32 %v1787_v32, %v1764_v9 }
 0xeb5   :  { %v1791_v36 = vmul.f32 0.5, %v1790_v33  ;;  %v1803_v37 = vmul.f32 %v2047_v30, %v1798_v35 }
 0xeb7   :  { %v1792_v38 = vsub.f32 1.5, %v1791_v36  ;;  %v1808_v39 = vadd.f32 %v2048_v8, %v1803_v37 }
 0xeb9   :  { %v1793_v41 = vmul.f32 %v2132_v26, %v1792_v38  ;;  %v1812_v42 = vsel %vm150_vm0, %v1808_v39, 0.0 }
 0xeba   :  { %1813 = vadd.xlane.f32.xlu2 %v1812_v42 }
 0xebb   :  { %v1797_v43 = vsel %vm1796_vm14, %v2132_v26, %v1793_v41 }
 0xebc   :  { %v1799_v44 = vmul.f32 %v1797_v43, %v1765_v34 }
 0xebe   :  { %v1804_v45 = vmul.f32 %v2047_v30, %v1799_v44 }
 0xec0   :  { %v1809_v46 = vadd.f32 %v2048_v8, %v1804_v45 }
 0xec2   :  { %v1815_v47 = vsel %vm150_vm0, %v1809_v46, 0.0 }
 0xec3   :  { %1816 = vadd.xlane.f32.xlu1 %v1815_v47 }
 0xf2d   :  { %v1814_v4 = vpop.xlane.xlu2 %1813 }
 0xf2e   :  { %v1818_v49 = vmul.f32 %v1814_v4, %v2588_v48 }
 0xf30   :  { %v1820_v50 = vsub.f32 %v1808_v39, %v1818_v49 }
 0xf32   :  { %v1822_v10 = vmul.f32 %v1820_v50, %v1820_v50 }
 0xf34   :  { %v1824_v5 = vsel %vm150_vm0, %v1822_v10, 0.0 }
 0xf35   :  { %1825 = vadd.xlane.f32.xlu0 %v1824_v5 }
 0xf36   :  { %v1817_v51 = vpop.xlane.xlu1 %1816 }
 0xf37   :  { %v1819_v52 = vmul.f32 %v1817_v51, %v2588_v48 }
 0xf39   :  { %v1821_v53 = vsub.f32 %v1809_v46, %v1819_v52 }
 0xf3b   :  { %v1823_v54 = vmul.f32 %v1821_v53, %v1821_v53 }
 0xf3d   :  { %v1827_v55 = vsel %vm150_vm0, %v1823_v54, 0.0 }
 0xf3e   :  { %1828 = vadd.xlane.f32.xlu2 %v1827_v55 }
 0xfa8   :  { %v1826_v56 = vpop.xlane.xlu0 %1825 }
 0xfa9   :  { %v1830_v57 = vmul.f32 %v1826_v56, %v2588_v48 }
 0xfab   :  { %v1832_v58 = vadd.f32 1e-05, %v1830_v57 }
 0xfad   :  { %2133 = vrsqrt.f32 %v1832_v58  ;;  %vm1840_vm4 = vweird.f32 %v1832_v58 }
 0xfb1   :  { %v1829_v59 = vpop.xlane.xlu2 %1828 }
 0xfb2   :  { %v1831_v61 = vmul.f32 %v1829_v59, %v2588_v48 }
 0xfb3   :  { %v2134_v60 = vpop.eup %2133 }
 0xfb4   :  { %v1835_v62 = vmul.f32 %v2134_v60, %v1832_v58  ;;  %v1833_v63 = vadd.f32 1e-05, %v1831_v61  ;;  %vm1841_vm15 = vweird.f32 %v2134_v60 }
 0xfb5   :  { %vm1842_vm5 = vmor %vm1840_vm4, %vm1841_vm15 }
 0xfb6   :  { %v1836_v0 = vmul.f32 %v2134_v60, %v1835_v62  ;;  %2135 = vrsqrt.f32 %v1833_v63  ;;  %vm1850_vm2 = vweird.f32 %v1833_v63 }
 0xfb8   :  { %v1837_v40 = vmul.f32 0.5, %v1836_v0 }
 0xfba   :  { %v1838_v1 = vsub.f32 1.5, %v1837_v40 }
 0xfbc   :  { %v2136_v2 = vpop.eup %2135  ;;  %v1839_v3 = vmul.f32 %v2134_v60, %v1838_v1 }
 0xfbd   :  { %v1845_v7 = vmul.f32 %v2136_v2, %v1833_v63  ;;  %vm1851_vm1 = vweird.f32 %v2136_v2 }
 0xfbe   :  { %v1843_v9 = vsel %vm1842_vm5, %v2134_v60, %v1839_v3  ;;  %vm1852_vm3 = vmor %vm1850_vm2, %vm1851_vm1 }
 0xfbf   :  { %v1854_v22 = vmul.f32 %v1843_v9, %v1820_v50  ;;  %v1846_v48 = vmul.f32 %v2136_v2, %v1845_v7 }
 0xfc1   :  { %v1859_v12 = vmul.f32 %v2049_v6, %v1854_v22  ;;  %v1847_v13 = vmul.f32 0.5, %v1846_v48 }
 0xfc3   :  { %v1848_v34 = vsub.f32 1.5, %v1847_v13  ;;  %v1864_v14 = vadd.f32 %v2050_v11, %v1859_v12 }
 0xfc5   :  { %v1849_v15 = vmul.f32 %v2136_v2, %v1848_v34  ;;  %1866 = vst.msk [vmem:[#allocation11] sm:$0xff] %vm150_vm0, %v1864_v14 }
 0xfc7   :  { %v1853_v16 = vsel %vm1852_vm3, %v2136_v2, %v1849_v15 }
 0xfc8   :  { %v1855_v17 = vmul.f32 %v1853_v16, %v1821_v53 }
 0xfca   :  { %v1860_v18 = vmul.f32 %v2049_v6, %v1855_v17 }
 0xfcc   :  { %v1865_v19 = vadd.f32 %v2050_v11, %v1860_v18 }
 0xfce   :  { %1867 = vst.msk [vmem:[#allocation11 + $0x8] sm:$0xff] %vm150_vm0, %v1865_v19 }
 0xfcf   :  { %1880 = dma.vmem_to_hbm [thread:$0]  %s1873_s2, 256, %s1875_s18, [#allocation4], %s2909_s15, %s2909_s15, %s2907_s0  }
 0xfd0   :  { %2287 = dma.done.wait [#allocation4], 256  }
 0xfd1   :  { %2288 = vsyncadd [#allocation4], 4294967040 }
 0xfd2   :  { %1885 = vsyncpa [#allocation3], 1 }
 0xfd3   :  { %1886 = vsyncpa [#allocation6], 1 }
 0xfd4   :  { %1887 = vsyncpa [#allocation9], 1 }
 0xfd5   :  { %1888 = vsyncpa [#allocation4], 1 }

</bundles_post_ra>
